<compile_context>
chip_gen: v5e
topology: v5e:2x2
jax: 0.10.0
libtpu: 0.0.40
codegen_flags: <defaults>
</compile_context>

<pallas_src>
import jax
import jax.numpy as jnp
import numpy as np
from jax.experimental import pallas as pl
from jax.experimental.pallas import tpu as pltpu


def gru_head_kernel(x_ref, len_ref, wih_ref, whh_ref, bih_ref, bhh_ref,
                    wout_ref, bout_ref, out_ref):
    """Backward-direction GRU over valid timesteps + Linear head + log_softmax.

    x_ref    : (T*B, E)  bf16   time-major embeddings flattened to rows
    len_ref  : (B, 1)    int32  sequence lengths
    wih_ref  : (3, E, H) bf16   per-gate input weights, gate order [r|z|n]
    whh_ref  : (3, H, H) bf16   per-gate hidden weights
    bih_ref  : (3, 1, H) f32    per-gate input biases
    bhh_ref  : (3, 1, H) f32    per-gate hidden biases
    wout_ref : (H, n_out) f32   output head weight
    bout_ref : (1, n_out) f32   output head bias
    out_ref  : (B, n_out) f32   log-probs
    """
    TB, _ = x_ref.shape
    H = whh_ref.shape[-1]
    B = len_ref.shape[0]
    T = TB // B

    # Load everything once (hoisted out of the recurrence).
    x_all = x_ref[...]                                   # (T*B, E) bf16
    lens = len_ref[...]                                  # (B, 1)   i32
    wih_r, wih_z, wih_n = wih_ref[0], wih_ref[1], wih_ref[2]   # (E, H) bf16
    whh_r, whh_z, whh_n = whh_ref[0], whh_ref[1], whh_ref[2]   # (H, H) bf16
    bih_r, bih_z, bih_n = bih_ref[0], bih_ref[1], bih_ref[2]   # (1, H) f32
    bhh_r, bhh_z, bhh_n = bhh_ref[0], bhh_ref[1], bhh_ref[2]   # (1, H) f32

    # Hoisted input projection: one big matmul per gate, MXU bf16 path with
    # f32 accumulation.  b_hh_{r,z} fold straight into the pre-activation;
    # b_hh_n must stay inside the r * (.) term (PyTorch GRU formula).
    gi_r = jnp.dot(x_all, wih_r, preferred_element_type=jnp.float32) + (bih_r + bhh_r)
    gi_z = jnp.dot(x_all, wih_z, preferred_element_type=jnp.float32) + (bih_z + bhh_z)
    gi_n = jnp.dot(x_all, wih_n, preferred_element_type=jnp.float32) + bih_n

    # Reverse (backward-direction) recurrence, fully unrolled: only the tiny
    # h @ W_hh matmuls + VPU/EUP gate math remain on the serial critical path.
    h = jnp.zeros((B, H), dtype=jnp.float32)
    for t in range(T - 1, -1, -1):
        lo = t * B
        h_b = h.astype(jnp.bfloat16)
        gh_r = jnp.dot(h_b, whh_r, preferred_element_type=jnp.float32)
        gh_z = jnp.dot(h_b, whh_z, preferred_element_type=jnp.float32)
        gh_n = jnp.dot(h_b, whh_n, preferred_element_type=jnp.float32)
        r = jax.nn.sigmoid(gi_r[lo:lo + B, :] + gh_r)
        z = jax.nn.sigmoid(gi_z[lo:lo + B, :] + gh_z)
        n = jnp.tanh(gi_n[lo:lo + B, :] + r * (gh_n + bhh_n))
        h_new = n + z * (h - n)                 # == (1 - z) * n + z * h
        # Packed-sequence semantics: only rows whose length covers t update.
        h = jnp.where(t < lens, h_new, h)

    # Linear head (kept f32: tiny, single use) + stable log_softmax.
    logits = jnp.dot(h, wout_ref[...], preferred_element_type=jnp.float32) + bout_ref[...]
    m = jnp.max(logits, axis=-1, keepdims=True)
    lse = jnp.log(jnp.sum(jnp.exp(logits - m), axis=-1, keepdims=True)) + m
    out_ref[...] = logits - lse


def simple_gru_forward(seq, lengths, params):
    """seq: (T, B) int32 token ids; lengths: (B,) int32, sorted descending
    (as pack_padded_sequence with enforce_sorted=True requires)."""
    T, B = seq.shape
    E = params["emb"].shape[1]
    H = params["w_hh_rev"].shape[1]
    n_out = params["w_out"].shape[0]

    # Glue: frozen embedding lookup (gather) stays in plain JAX; flatten time
    # into rows so the in-kernel input projection is one (T*B, E) matmul.
    x_all = params["emb"][seq].reshape(T * B, E).astype(jnp.bfloat16)

    def split_gates_w(w):   # (3H, X) -> (3, X, H), PyTorch gate order [r|z|n]
        return jnp.stack([w[g * H:(g + 1) * H, :].T for g in range(3)], axis=0)

    w_ih = split_gates_w(params["w_ih_rev"]).astype(jnp.bfloat16)   # (3, E, H)
    w_hh = split_gates_w(params["w_hh_rev"]).astype(jnp.bfloat16)   # (3, H, H)
    b_ih = params["b_ih_rev"].astype(jnp.float32).reshape(3, 1, H)
    b_hh = params["b_hh_rev"].astype(jnp.float32).reshape(3, 1, H)

    # TODO(synk): gru_out (per-timestep outputs) and the forward-direction GRU
    # are unused by SimpleGRU.forward()'s return value and are not materialized.
    return pl.pallas_call(
        gru_head_kernel,
        out_shape=jax.ShapeDtypeStruct((B, n_out), jnp.float32),
        in_specs=[pl.BlockSpec(memory_space=pltpu.MemorySpace.VMEM)] * 8,
        out_specs=pl.BlockSpec(memory_space=pltpu.MemorySpace.VMEM),
    )(
        x_all,                                       # (T*B, E) bf16
        lengths.astype(jnp.int32).reshape(B, 1),     # (B, 1)
        w_ih, w_hh, b_ih, b_hh,                      # per-gate GRU params
        params["w_out"].T.astype(jnp.float32),       # (H, n_out)
        params["b_out"].astype(jnp.float32).reshape(1, -1),   # (1, n_out)
    )


def reference_forward(seq, lengths, params):
    """Pure-JAX reference mirroring the PyTorch semantics (backward GRU of the
    bidirectional layer on packed sequences -> Linear -> log_softmax), using the
    same bf16-inputs / f32-accumulation matmul precision as the kernel."""
    T, B = seq.shape
    H = params["w_hh_rev"].shape[1]
    embs = params["emb"][seq].astype(jnp.bfloat16)
    wih = params["w_ih_rev"].astype(jnp.bfloat16)
    whh = params["w_hh_rev"].astype(jnp.bfloat16)
    bih, bhh = params["b_ih_rev"], params["b_hh_rev"]
    h = jnp.zeros((B, H), jnp.float32)
    for t in range(T - 1, -1, -1):
        x = embs[t]
        gi = jnp.dot(x, wih.T, preferred_element_type=jnp.float32) + bih
        gh = jnp.dot(h.astype(jnp.bfloat16), whh.T,
                     preferred_element_type=jnp.float32) + bhh
        r = jax.nn.sigmoid(gi[:, :H] + gh[:, :H])
        z = jax.nn.sigmoid(gi[:, H:2 * H] + gh[:, H:2 * H])
        n = jnp.tanh(gi[:, 2 * H:] + r * gh[:, 2 * H:])
        h_new = (1.0 - z) * n + z * h
        mask = (t < lengths)[:, None]
        h = jnp.where(mask, h_new, h)
    logits = jnp.dot(h, params["w_out"].T,
                     preferred_element_type=jnp.float32) + params["b_out"]
    return jax.nn.log_softmax(logits, axis=-1)


if __name__ == "__main__":
    vocab_size, embedding_dim, n_hidden, n_out = 50, 16, 32, 4
    T, B = 8, 2

    key = jax.random.PRNGKey(0)
    keys = jax.random.split(key, 8)
    k = 1.0 / float(np.sqrt(n_hidden))
    params = {
        # "pretrained_vec" stand-in for the frozen embedding table.
        "emb":      jax.random.normal(keys[0], (vocab_size, embedding_dim), jnp.float32),
        "w_ih_rev": jax.random.uniform(keys[1], (3 * n_hidden, embedding_dim), jnp.float32, -k, k),
        "w_hh_rev": jax.random.uniform(keys[2], (3 * n_hidden, n_hidden), jnp.float32, -k, k),
        "b_ih_rev": jax.random.uniform(keys[3], (3 * n_hidden,), jnp.float32, -k, k),
        "b_hh_rev": jax.random.uniform(keys[4], (3 * n_hidden,), jnp.float32, -k, k),
        "w_out":    jax.random.uniform(keys[5], (n_out, n_hidden), jnp.float32, -k, k),
        "b_out":    jax.random.uniform(keys[6], (n_out,), jnp.float32, -k, k),
    }

    seq = jax.random.randint(keys[7], (T, B), 0, vocab_size, dtype=jnp.int32)
    lengths = jnp.array([8, 5], dtype=jnp.int32)    # sorted descending, <= T

    out = simple_gru_forward(seq, lengths, params)
    out = jax.block_until_ready(out)

    ref = reference_forward(seq, lengths, params)
    assert out.shape == (B, n_out)
    np.testing.assert_allclose(np.asarray(out), np.asarray(ref), rtol=1e-3, atol=1e-4)
    print("KERNEL_OK")
</pallas_src>

<mosaic_0001>
module attributes {stable_mosaic.version = 11 : i64} {
  func.func @gru_head_kernel(%arg0: memref<16x16xbf16, #tpu.memory_space<vmem>>, %arg1: memref<2x1xi32, #tpu.memory_space<vmem>>, %arg2: memref<3x16x32xbf16, #tpu.memory_space<vmem>>, %arg3: memref<3x32x32xbf16, #tpu.memory_space<vmem>>, %arg4: memref<3x1x32xf32, #tpu.memory_space<vmem>>, %arg5: memref<3x1x32xf32, #tpu.memory_space<vmem>>, %arg6: memref<32x4xf32, #tpu.memory_space<vmem>>, %arg7: memref<1x4xf32, #tpu.memory_space<vmem>>, %arg8: memref<2x4xf32, #tpu.memory_space<vmem>>) attributes {dimension_semantics = [], scalar_prefetch = 0 : i64, scratch_operands = 0 : i64, tpu.core_type = #tpu.core_type<tc>} {
    %c0 = arith.constant 0 : index
    %c0_0 = arith.constant 0 : index
    %0 = vector.load %arg0[%c0, %c0_0] : memref<16x16xbf16, #tpu.memory_space<vmem>>, vector<16x16xbf16>
    %c0_1 = arith.constant 0 : index
    %c0_2 = arith.constant 0 : index
    %1 = vector.load %arg1[%c0_1, %c0_2] : memref<2x1xi32, #tpu.memory_space<vmem>>, vector<2x1xi32>
    %c0_3 = arith.constant 0 : index
    %c0_4 = arith.constant 0 : index
    %c0_5 = arith.constant 0 : index
    %2 = vector.load %arg2[%c0_3, %c0_4, %c0_5] : memref<3x16x32xbf16, #tpu.memory_space<vmem>>, vector<1x16x32xbf16>
    %3 = vector.shape_cast %2 : vector<1x16x32xbf16> to vector<16x32xbf16>
    %c1 = arith.constant 1 : index
    %c0_6 = arith.constant 0 : index
    %c0_7 = arith.constant 0 : index
    %4 = vector.load %arg2[%c1, %c0_6, %c0_7] : memref<3x16x32xbf16, #tpu.memory_space<vmem>>, vector<1x16x32xbf16>
    %5 = vector.shape_cast %4 : vector<1x16x32xbf16> to vector<16x32xbf16>
    %c2 = arith.constant 2 : index
    %c0_8 = arith.constant 0 : index
    %c0_9 = arith.constant 0 : index
    %6 = vector.load %arg2[%c2, %c0_8, %c0_9] : memref<3x16x32xbf16, #tpu.memory_space<vmem>>, vector<1x16x32xbf16>
    %7 = vector.shape_cast %6 : vector<1x16x32xbf16> to vector<16x32xbf16>
    %c0_10 = arith.constant 0 : index
    %c0_11 = arith.constant 0 : index
    %c0_12 = arith.constant 0 : index
    %8 = vector.load %arg3[%c0_10, %c0_11, %c0_12] : memref<3x32x32xbf16, #tpu.memory_space<vmem>>, vector<1x32x32xbf16>
    %9 = vector.shape_cast %8 : vector<1x32x32xbf16> to vector<32x32xbf16>
    %c1_13 = arith.constant 1 : index
    %c0_14 = arith.constant 0 : index
    %c0_15 = arith.constant 0 : index
    %10 = vector.load %arg3[%c1_13, %c0_14, %c0_15] : memref<3x32x32xbf16, #tpu.memory_space<vmem>>, vector<1x32x32xbf16>
    %11 = vector.shape_cast %10 : vector<1x32x32xbf16> to vector<32x32xbf16>
    %c2_16 = arith.constant 2 : index
    %c0_17 = arith.constant 0 : index
    %c0_18 = arith.constant 0 : index
    %12 = vector.load %arg3[%c2_16, %c0_17, %c0_18] : memref<3x32x32xbf16, #tpu.memory_space<vmem>>, vector<1x32x32xbf16>
    %13 = vector.shape_cast %12 : vector<1x32x32xbf16> to vector<32x32xbf16>
    %c0_19 = arith.constant 0 : index
    %c0_20 = arith.constant 0 : index
    %c0_21 = arith.constant 0 : index
    %14 = vector.load %arg4[%c0_19, %c0_20, %c0_21] : memref<3x1x32xf32, #tpu.memory_space<vmem>>, vector<1x1x32xf32>
    %15 = vector.shape_cast %14 : vector<1x1x32xf32> to vector<1x32xf32>
    %c1_22 = arith.constant 1 : index
    %c0_23 = arith.constant 0 : index
    %c0_24 = arith.constant 0 : index
    %16 = vector.load %arg4[%c1_22, %c0_23, %c0_24] : memref<3x1x32xf32, #tpu.memory_space<vmem>>, vector<1x1x32xf32>
    %17 = vector.shape_cast %16 : vector<1x1x32xf32> to vector<1x32xf32>
    %c2_25 = arith.constant 2 : index
    %c0_26 = arith.constant 0 : index
    %c0_27 = arith.constant 0 : index
    %18 = vector.load %arg4[%c2_25, %c0_26, %c0_27] : memref<3x1x32xf32, #tpu.memory_space<vmem>>, vector<1x1x32xf32>
    %19 = vector.shape_cast %18 : vector<1x1x32xf32> to vector<1x32xf32>
    %c0_28 = arith.constant 0 : index
    %c0_29 = arith.constant 0 : index
    %c0_30 = arith.constant 0 : index
    %20 = vector.load %arg5[%c0_28, %c0_29, %c0_30] : memref<3x1x32xf32, #tpu.memory_space<vmem>>, vector<1x1x32xf32>
    %21 = vector.shape_cast %20 : vector<1x1x32xf32> to vector<1x32xf32>
    %c1_31 = arith.constant 1 : index
    %c0_32 = arith.constant 0 : index
    %c0_33 = arith.constant 0 : index
    %22 = vector.load %arg5[%c1_31, %c0_32, %c0_33] : memref<3x1x32xf32, #tpu.memory_space<vmem>>, vector<1x1x32xf32>
    %23 = vector.shape_cast %22 : vector<1x1x32xf32> to vector<1x32xf32>
    %c2_34 = arith.constant 2 : index
    %c0_35 = arith.constant 0 : index
    %c0_36 = arith.constant 0 : index
    %24 = vector.load %arg5[%c2_34, %c0_35, %c0_36] : memref<3x1x32xf32, #tpu.memory_space<vmem>>, vector<1x1x32xf32>
    %25 = vector.shape_cast %24 : vector<1x1x32xf32> to vector<1x32xf32>
    %cst = arith.constant dense<0.000000e+00> : vector<16x32xf32>
    %26 = tpu.matmul %0, %3, %cst {dimension_numbers = #tpu.dot_dimension_numbers<[1], [0], [0], [1], [0, 0, 1, 1], [], []>} : vector<16x16xbf16>, vector<16x32xbf16>, vector<16x32xf32> -> vector<16x32xf32>
    %27 = arith.addf %15, %21 : vector<1x32xf32>
    %28 = vector.broadcast %27 : vector<1x32xf32> to vector<16x32xf32>
    %29 = arith.addf %26, %28 : vector<16x32xf32>
    %cst_37 = arith.constant dense<0.000000e+00> : vector<16x32xf32>
    %30 = tpu.matmul %0, %5, %cst_37 {dimension_numbers = #tpu.dot_dimension_numbers<[1], [0], [0], [1], [0, 0, 1, 1], [], []>} : vector<16x16xbf16>, vector<16x32xbf16>, vector<16x32xf32> -> vector<16x32xf32>
    %31 = arith.addf %17, %23 : vector<1x32xf32>
    %32 = vector.broadcast %31 : vector<1x32xf32> to vector<16x32xf32>
    %33 = arith.addf %30, %32 : vector<16x32xf32>
    %cst_38 = arith.constant dense<0.000000e+00> : vector<16x32xf32>
    %34 = tpu.matmul %0, %7, %cst_38 {dimension_numbers = #tpu.dot_dimension_numbers<[1], [0], [0], [1], [0, 0, 1, 1], [], []>} : vector<16x16xbf16>, vector<16x32xbf16>, vector<16x32xf32> -> vector<16x32xf32>
    %35 = vector.broadcast %19 : vector<1x32xf32> to vector<16x32xf32>
    %36 = arith.addf %34, %35 : vector<16x32xf32>
    %cst_39 = arith.constant 0.000000e+00 : f32
    %37 = vector.broadcast %cst_39 : f32 to vector<2x32xf32>
    %38 = arith.truncf %37 : vector<2x32xf32> to vector<2x32xbf16>
    %cst_40 = arith.constant dense<0.000000e+00> : vector<2x32xf32>
    %39 = tpu.matmul %38, %9, %cst_40 {dimension_numbers = #tpu.dot_dimension_numbers<[1], [0], [0], [1], [0, 0, 1, 1], [], []>} : vector<2x32xbf16>, vector<32x32xbf16>, vector<2x32xf32> -> vector<2x32xf32>
    %cst_41 = arith.constant dense<0.000000e+00> : vector<2x32xf32>
    %40 = tpu.matmul %38, %11, %cst_41 {dimension_numbers = #tpu.dot_dimension_numbers<[1], [0], [0], [1], [0, 0, 1, 1], [], []>} : vector<2x32xbf16>, vector<32x32xbf16>, vector<2x32xf32> -> vector<2x32xf32>
    %cst_42 = arith.constant dense<0.000000e+00> : vector<2x32xf32>
    %41 = tpu.matmul %38, %13, %cst_42 {dimension_numbers = #tpu.dot_dimension_numbers<[1], [0], [0], [1], [0, 0, 1, 1], [], []>} : vector<2x32xbf16>, vector<32x32xbf16>, vector<2x32xf32> -> vector<2x32xf32>
    %42 = vector.extract_strided_slice %29 {offsets = [14, 0], sizes = [2, 32], strides = [1, 1]} : vector<16x32xf32> to vector<2x32xf32>
    %43 = arith.addf %42, %39 : vector<2x32xf32>
    %44 = arith.negf %43 : vector<2x32xf32>
    %45 = math.exp %44 : vector<2x32xf32>
    %cst_43 = arith.constant 1.000000e+00 : f32
    %46 = vector.broadcast %cst_43 : f32 to vector<2x32xf32>
    %47 = arith.addf %46, %45 : vector<2x32xf32>
    %48 = arith.divf %46, %47 : vector<2x32xf32>
    %49 = vector.extract_strided_slice %33 {offsets = [14, 0], sizes = [2, 32], strides = [1, 1]} : vector<16x32xf32> to vector<2x32xf32>
    %50 = arith.addf %49, %40 : vector<2x32xf32>
    %51 = arith.negf %50 : vector<2x32xf32>
    %52 = math.exp %51 : vector<2x32xf32>
    %cst_44 = arith.constant 1.000000e+00 : f32
    %53 = vector.broadcast %cst_44 : f32 to vector<2x32xf32>
    %54 = arith.addf %53, %52 : vector<2x32xf32>
    %55 = arith.divf %53, %54 : vector<2x32xf32>
    %56 = vector.extract_strided_slice %36 {offsets = [14, 0], sizes = [2, 32], strides = [1, 1]} : vector<16x32xf32> to vector<2x32xf32>
    %57 = vector.broadcast %25 : vector<1x32xf32> to vector<2x32xf32>
    %58 = arith.addf %41, %57 : vector<2x32xf32>
    %59 = arith.mulf %48, %58 : vector<2x32xf32>
    %60 = arith.addf %56, %59 : vector<2x32xf32>
    %61 = math.tanh %60 : vector<2x32xf32>
    %62 = arith.subf %37, %61 : vector<2x32xf32>
    %63 = arith.mulf %55, %62 : vector<2x32xf32>
    %64 = arith.addf %61, %63 : vector<2x32xf32>
    %c7_i32 = arith.constant 7 : i32
    %65 = vector.broadcast %c7_i32 : i32 to vector<2x1xi32>
    %66 = arith.cmpi sgt, %1, %65 : vector<2x1xi32>
    %67 = vector.shape_cast %66 : vector<2x1xi1> to vector<2x1xi1>
    %68 = vector.broadcast %67 : vector<2x1xi1> to vector<2x32xi1>
    %69 = arith.select %68, %64, %37 : vector<2x32xi1>, vector<2x32xf32>
    %70 = arith.truncf %69 : vector<2x32xf32> to vector<2x32xbf16>
    %cst_45 = arith.constant dense<0.000000e+00> : vector<2x32xf32>
    %71 = tpu.matmul %70, %9, %cst_45 {dimension_numbers = #tpu.dot_dimension_numbers<[1], [0], [0], [1], [0, 0, 1, 1], [], []>} : vector<2x32xbf16>, vector<32x32xbf16>, vector<2x32xf32> -> vector<2x32xf32>
    %cst_46 = arith.constant dense<0.000000e+00> : vector<2x32xf32>
    %72 = tpu.matmul %70, %11, %cst_46 {dimension_numbers = #tpu.dot_dimension_numbers<[1], [0], [0], [1], [0, 0, 1, 1], [], []>} : vector<2x32xbf16>, vector<32x32xbf16>, vector<2x32xf32> -> vector<2x32xf32>
    %cst_47 = arith.constant dense<0.000000e+00> : vector<2x32xf32>
    %73 = tpu.matmul %70, %13, %cst_47 {dimension_numbers = #tpu.dot_dimension_numbers<[1], [0], [0], [1], [0, 0, 1, 1], [], []>} : vector<2x32xbf16>, vector<32x32xbf16>, vector<2x32xf32> -> vector<2x32xf32>
    %74 = vector.extract_strided_slice %29 {offsets = [12, 0], sizes = [2, 32], strides = [1, 1]} : vector<16x32xf32> to vector<2x32xf32>
    %75 = arith.addf %74, %71 : vector<2x32xf32>
    %76 = arith.negf %75 : vector<2x32xf32>
    %77 = math.exp %76 : vector<2x32xf32>
    %cst_48 = arith.constant 1.000000e+00 : f32
    %78 = vector.broadcast %cst_48 : f32 to vector<2x32xf32>
    %79 = arith.addf %78, %77 : vector<2x32xf32>
    %80 = arith.divf %78, %79 : vector<2x32xf32>
    %81 = vector.extract_strided_slice %33 {offsets = [12, 0], sizes = [2, 32], strides = [1, 1]} : vector<16x32xf32> to vector<2x32xf32>
    %82 = arith.addf %81, %72 : vector<2x32xf32>
    %83 = arith.negf %82 : vector<2x32xf32>
    %84 = math.exp %83 : vector<2x32xf32>
    %cst_49 = arith.constant 1.000000e+00 : f32
    %85 = vector.broadcast %cst_49 : f32 to vector<2x32xf32>
    %86 = arith.addf %85, %84 : vector<2x32xf32>
    %87 = arith.divf %85, %86 : vector<2x32xf32>
    %88 = vector.extract_strided_slice %36 {offsets = [12, 0], sizes = [2, 32], strides = [1, 1]} : vector<16x32xf32> to vector<2x32xf32>
    %89 = vector.broadcast %25 : vector<1x32xf32> to vector<2x32xf32>
    %90 = arith.addf %73, %89 : vector<2x32xf32>
    %91 = arith.mulf %80, %90 : vector<2x32xf32>
    %92 = arith.addf %88, %91 : vector<2x32xf32>
    %93 = math.tanh %92 : vector<2x32xf32>
    %94 = arith.subf %69, %93 : vector<2x32xf32>
    %95 = arith.mulf %87, %94 : vector<2x32xf32>
    %96 = arith.addf %93, %95 : vector<2x32xf32>
    %c6_i32 = arith.constant 6 : i32
    %97 = vector.broadcast %c6_i32 : i32 to vector<2x1xi32>
    %98 = arith.cmpi sgt, %1, %97 : vector<2x1xi32>
    %99 = vector.shape_cast %98 : vector<2x1xi1> to vector<2x1xi1>
    %100 = vector.broadcast %99 : vector<2x1xi1> to vector<2x32xi1>
    %101 = arith.select %100, %96, %69 : vector<2x32xi1>, vector<2x32xf32>
    %102 = arith.truncf %101 : vector<2x32xf32> to vector<2x32xbf16>
    %cst_50 = arith.constant dense<0.000000e+00> : vector<2x32xf32>
    %103 = tpu.matmul %102, %9, %cst_50 {dimension_numbers = #tpu.dot_dimension_numbers<[1], [0], [0], [1], [0, 0, 1, 1], [], []>} : vector<2x32xbf16>, vector<32x32xbf16>, vector<2x32xf32> -> vector<2x32xf32>
    %cst_51 = arith.constant dense<0.000000e+00> : vector<2x32xf32>
    %104 = tpu.matmul %102, %11, %cst_51 {dimension_numbers = #tpu.dot_dimension_numbers<[1], [0], [0], [1], [0, 0, 1, 1], [], []>} : vector<2x32xbf16>, vector<32x32xbf16>, vector<2x32xf32> -> vector<2x32xf32>
    %cst_52 = arith.constant dense<0.000000e+00> : vector<2x32xf32>
    %105 = tpu.matmul %102, %13, %cst_52 {dimension_numbers = #tpu.dot_dimension_numbers<[1], [0], [0], [1], [0, 0, 1, 1], [], []>} : vector<2x32xbf16>, vector<32x32xbf16>, vector<2x32xf32> -> vector<2x32xf32>
    %106 = vector.extract_strided_slice %29 {offsets = [10, 0], sizes = [2, 32], strides = [1, 1]} : vector<16x32xf32> to vector<2x32xf32>
    %107 = arith.addf %106, %103 : vector<2x32xf32>
    %108 = arith.negf %107 : vector<2x32xf32>
    %109 = math.exp %108 : vector<2x32xf32>
    %cst_53 = arith.constant 1.000000e+00 : f32
    %110 = vector.broadcast %cst_53 : f32 to vector<2x32xf32>
    %111 = arith.addf %110, %109 : vector<2x32xf32>
    %112 = arith.divf %110, %111 : vector<2x32xf32>
    %113 = vector.extract_strided_slice %33 {offsets = [10, 0], sizes = [2, 32], strides = [1, 1]} : vector<16x32xf32> to vector<2x32xf32>
    %114 = arith.addf %113, %104 : vector<2x32xf32>
    %115 = arith.negf %114 : vector<2x32xf32>
    %116 = math.exp %115 : vector<2x32xf32>
    %cst_54 = arith.constant 1.000000e+00 : f32
    %117 = vector.broadcast %cst_54 : f32 to vector<2x32xf32>
    %118 = arith.addf %117, %116 : vector<2x32xf32>
    %119 = arith.divf %117, %118 : vector<2x32xf32>
    %120 = vector.extract_strided_slice %36 {offsets = [10, 0], sizes = [2, 32], strides = [1, 1]} : vector<16x32xf32> to vector<2x32xf32>
    %121 = vector.broadcast %25 : vector<1x32xf32> to vector<2x32xf32>
    %122 = arith.addf %105, %121 : vector<2x32xf32>
    %123 = arith.mulf %112, %122 : vector<2x32xf32>
    %124 = arith.addf %120, %123 : vector<2x32xf32>
    %125 = math.tanh %124 : vector<2x32xf32>
    %126 = arith.subf %101, %125 : vector<2x32xf32>
    %127 = arith.mulf %119, %126 : vector<2x32xf32>
    %128 = arith.addf %125, %127 : vector<2x32xf32>
    %c5_i32 = arith.constant 5 : i32
    %129 = vector.broadcast %c5_i32 : i32 to vector<2x1xi32>
    %130 = arith.cmpi sgt, %1, %129 : vector<2x1xi32>
    %131 = vector.shape_cast %130 : vector<2x1xi1> to vector<2x1xi1>
    %132 = vector.broadcast %131 : vector<2x1xi1> to vector<2x32xi1>
    %133 = arith.select %132, %128, %101 : vector<2x32xi1>, vector<2x32xf32>
    %134 = arith.truncf %133 : vector<2x32xf32> to vector<2x32xbf16>
    %cst_55 = arith.constant dense<0.000000e+00> : vector<2x32xf32>
    %135 = tpu.matmul %134, %9, %cst_55 {dimension_numbers = #tpu.dot_dimension_numbers<[1], [0], [0], [1], [0, 0, 1, 1], [], []>} : vector<2x32xbf16>, vector<32x32xbf16>, vector<2x32xf32> -> vector<2x32xf32>
    %cst_56 = arith.constant dense<0.000000e+00> : vector<2x32xf32>
    %136 = tpu.matmul %134, %11, %cst_56 {dimension_numbers = #tpu.dot_dimension_numbers<[1], [0], [0], [1], [0, 0, 1, 1], [], []>} : vector<2x32xbf16>, vector<32x32xbf16>, vector<2x32xf32> -> vector<2x32xf32>
    %cst_57 = arith.constant dense<0.000000e+00> : vector<2x32xf32>
    %137 = tpu.matmul %134, %13, %cst_57 {dimension_numbers = #tpu.dot_dimension_numbers<[1], [0], [0], [1], [0, 0, 1, 1], [], []>} : vector<2x32xbf16>, vector<32x32xbf16>, vector<2x32xf32> -> vector<2x32xf32>
    %138 = vector.extract_strided_slice %29 {offsets = [8, 0], sizes = [2, 32], strides = [1, 1]} : vector<16x32xf32> to vector<2x32xf32>
    %139 = arith.addf %138, %135 : vector<2x32xf32>
    %140 = arith.negf %139 : vector<2x32xf32>
    %141 = math.exp %140 : vector<2x32xf32>
    %cst_58 = arith.constant 1.000000e+00 : f32
    %142 = vector.broadcast %cst_58 : f32 to vector<2x32xf32>
    %143 = arith.addf %142, %141 : vector<2x32xf32>
    %144 = arith.divf %142, %143 : vector<2x32xf32>
    %145 = vector.extract_strided_slice %33 {offsets = [8, 0], sizes = [2, 32], strides = [1, 1]} : vector<16x32xf32> to vector<2x32xf32>
    %146 = arith.addf %145, %136 : vector<2x32xf32>
    %147 = arith.negf %146 : vector<2x32xf32>
    %148 = math.exp %147 : vector<2x32xf32>
    %cst_59 = arith.constant 1.000000e+00 : f32
    %149 = vector.broadcast %cst_59 : f32 to vector<2x32xf32>
    %150 = arith.addf %149, %148 : vector<2x32xf32>
    %151 = arith.divf %149, %150 : vector<2x32xf32>
    %152 = vector.extract_strided_slice %36 {offsets = [8, 0], sizes = [2, 32], strides = [1, 1]} : vector<16x32xf32> to vector<2x32xf32>
    %153 = vector.broadcast %25 : vector<1x32xf32> to vector<2x32xf32>
    %154 = arith.addf %137, %153 : vector<2x32xf32>
    %155 = arith.mulf %144, %154 : vector<2x32xf32>
    %156 = arith.addf %152, %155 : vector<2x32xf32>
    %157 = math.tanh %156 : vector<2x32xf32>
    %158 = arith.subf %133, %157 : vector<2x32xf32>
    %159 = arith.mulf %151, %158 : vector<2x32xf32>
    %160 = arith.addf %157, %159 : vector<2x32xf32>
    %c4_i32 = arith.constant 4 : i32
    %161 = vector.broadcast %c4_i32 : i32 to vector<2x1xi32>
    %162 = arith.cmpi sgt, %1, %161 : vector<2x1xi32>
    %163 = vector.shape_cast %162 : vector<2x1xi1> to vector<2x1xi1>
    %164 = vector.broadcast %163 : vector<2x1xi1> to vector<2x32xi1>
    %165 = arith.select %164, %160, %133 : vector<2x32xi1>, vector<2x32xf32>
    %166 = arith.truncf %165 : vector<2x32xf32> to vector<2x32xbf16>
    %cst_60 = arith.constant dense<0.000000e+00> : vector<2x32xf32>
    %167 = tpu.matmul %166, %9, %cst_60 {dimension_numbers = #tpu.dot_dimension_numbers<[1], [0], [0], [1], [0, 0, 1, 1], [], []>} : vector<2x32xbf16>, vector<32x32xbf16>, vector<2x32xf32> -> vector<2x32xf32>
    %cst_61 = arith.constant dense<0.000000e+00> : vector<2x32xf32>
    %168 = tpu.matmul %166, %11, %cst_61 {dimension_numbers = #tpu.dot_dimension_numbers<[1], [0], [0], [1], [0, 0, 1, 1], [], []>} : vector<2x32xbf16>, vector<32x32xbf16>, vector<2x32xf32> -> vector<2x32xf32>
    %cst_62 = arith.constant dense<0.000000e+00> : vector<2x32xf32>
    %169 = tpu.matmul %166, %13, %cst_62 {dimension_numbers = #tpu.dot_dimension_numbers<[1], [0], [0], [1], [0, 0, 1, 1], [], []>} : vector<2x32xbf16>, vector<32x32xbf16>, vector<2x32xf32> -> vector<2x32xf32>
    %170 = vector.extract_strided_slice %29 {offsets = [6, 0], sizes = [2, 32], strides = [1, 1]} : vector<16x32xf32> to vector<2x32xf32>
    %171 = arith.addf %170, %167 : vector<2x32xf32>
    %172 = arith.negf %171 : vector<2x32xf32>
    %173 = math.exp %172 : vector<2x32xf32>
    %cst_63 = arith.constant 1.000000e+00 : f32
    %174 = vector.broadcast %cst_63 : f32 to vector<2x32xf32>
    %175 = arith.addf %174, %173 : vector<2x32xf32>
    %176 = arith.divf %174, %175 : vector<2x32xf32>
    %177 = vector.extract_strided_slice %33 {offsets = [6, 0], sizes = [2, 32], strides = [1, 1]} : vector<16x32xf32> to vector<2x32xf32>
    %178 = arith.addf %177, %168 : vector<2x32xf32>
    %179 = arith.negf %178 : vector<2x32xf32>
    %180 = math.exp %179 : vector<2x32xf32>
    %cst_64 = arith.constant 1.000000e+00 : f32
    %181 = vector.broadcast %cst_64 : f32 to vector<2x32xf32>
    %182 = arith.addf %181, %180 : vector<2x32xf32>
    %183 = arith.divf %181, %182 : vector<2x32xf32>
    %184 = vector.extract_strided_slice %36 {offsets = [6, 0], sizes = [2, 32], strides = [1, 1]} : vector<16x32xf32> to vector<2x32xf32>
    %185 = vector.broadcast %25 : vector<1x32xf32> to vector<2x32xf32>
    %186 = arith.addf %169, %185 : vector<2x32xf32>
    %187 = arith.mulf %176, %186 : vector<2x32xf32>
    %188 = arith.addf %184, %187 : vector<2x32xf32>
    %189 = math.tanh %188 : vector<2x32xf32>
    %190 = arith.subf %165, %189 : vector<2x32xf32>
    %191 = arith.mulf %183, %190 : vector<2x32xf32>
    %192 = arith.addf %189, %191 : vector<2x32xf32>
    %c3_i32 = arith.constant 3 : i32
    %193 = vector.broadcast %c3_i32 : i32 to vector<2x1xi32>
    %194 = arith.cmpi sgt, %1, %193 : vector<2x1xi32>
    %195 = vector.shape_cast %194 : vector<2x1xi1> to vector<2x1xi1>
    %196 = vector.broadcast %195 : vector<2x1xi1> to vector<2x32xi1>
    %197 = arith.select %196, %192, %165 : vector<2x32xi1>, vector<2x32xf32>
    %198 = arith.truncf %197 : vector<2x32xf32> to vector<2x32xbf16>
    %cst_65 = arith.constant dense<0.000000e+00> : vector<2x32xf32>
    %199 = tpu.matmul %198, %9, %cst_65 {dimension_numbers = #tpu.dot_dimension_numbers<[1], [0], [0], [1], [0, 0, 1, 1], [], []>} : vector<2x32xbf16>, vector<32x32xbf16>, vector<2x32xf32> -> vector<2x32xf32>
    %cst_66 = arith.constant dense<0.000000e+00> : vector<2x32xf32>
    %200 = tpu.matmul %198, %11, %cst_66 {dimension_numbers = #tpu.dot_dimension_numbers<[1], [0], [0], [1], [0, 0, 1, 1], [], []>} : vector<2x32xbf16>, vector<32x32xbf16>, vector<2x32xf32> -> vector<2x32xf32>
    %cst_67 = arith.constant dense<0.000000e+00> : vector<2x32xf32>
    %201 = tpu.matmul %198, %13, %cst_67 {dimension_numbers = #tpu.dot_dimension_numbers<[1], [0], [0], [1], [0, 0, 1, 1], [], []>} : vector<2x32xbf16>, vector<32x32xbf16>, vector<2x32xf32> -> vector<2x32xf32>
    %202 = vector.extract_strided_slice %29 {offsets = [4, 0], sizes = [2, 32], strides = [1, 1]} : vector<16x32xf32> to vector<2x32xf32>
    %203 = arith.addf %202, %199 : vector<2x32xf32>
    %204 = arith.negf %203 : vector<2x32xf32>
    %205 = math.exp %204 : vector<2x32xf32>
    %cst_68 = arith.constant 1.000000e+00 : f32
    %206 = vector.broadcast %cst_68 : f32 to vector<2x32xf32>
    %207 = arith.addf %206, %205 : vector<2x32xf32>
    %208 = arith.divf %206, %207 : vector<2x32xf32>
    %209 = vector.extract_strided_slice %33 {offsets = [4, 0], sizes = [2, 32], strides = [1, 1]} : vector<16x32xf32> to vector<2x32xf32>
    %210 = arith.addf %209, %200 : vector<2x32xf32>
    %211 = arith.negf %210 : vector<2x32xf32>
    %212 = math.exp %211 : vector<2x32xf32>
    %cst_69 = arith.constant 1.000000e+00 : f32
    %213 = vector.broadcast %cst_69 : f32 to vector<2x32xf32>
    %214 = arith.addf %213, %212 : vector<2x32xf32>
    %215 = arith.divf %213, %214 : vector<2x32xf32>
    %216 = vector.extract_strided_slice %36 {offsets = [4, 0], sizes = [2, 32], strides = [1, 1]} : vector<16x32xf32> to vector<2x32xf32>
    %217 = vector.broadcast %25 : vector<1x32xf32> to vector<2x32xf32>
    %218 = arith.addf %201, %217 : vector<2x32xf32>
    %219 = arith.mulf %208, %218 : vector<2x32xf32>
    %220 = arith.addf %216, %219 : vector<2x32xf32>
    %221 = math.tanh %220 : vector<2x32xf32>
    %222 = arith.subf %197, %221 : vector<2x32xf32>
    %223 = arith.mulf %215, %222 : vector<2x32xf32>
    %224 = arith.addf %221, %223 : vector<2x32xf32>
    %c2_i32 = arith.constant 2 : i32
    %225 = vector.broadcast %c2_i32 : i32 to vector<2x1xi32>
    %226 = arith.cmpi sgt, %1, %225 : vector<2x1xi32>
    %227 = vector.shape_cast %226 : vector<2x1xi1> to vector<2x1xi1>
    %228 = vector.broadcast %227 : vector<2x1xi1> to vector<2x32xi1>
    %229 = arith.select %228, %224, %197 : vector<2x32xi1>, vector<2x32xf32>
    %230 = arith.truncf %229 : vector<2x32xf32> to vector<2x32xbf16>
    %cst_70 = arith.constant dense<0.000000e+00> : vector<2x32xf32>
    %231 = tpu.matmul %230, %9, %cst_70 {dimension_numbers = #tpu.dot_dimension_numbers<[1], [0], [0], [1], [0, 0, 1, 1], [], []>} : vector<2x32xbf16>, vector<32x32xbf16>, vector<2x32xf32> -> vector<2x32xf32>
    %cst_71 = arith.constant dense<0.000000e+00> : vector<2x32xf32>
    %232 = tpu.matmul %230, %11, %cst_71 {dimension_numbers = #tpu.dot_dimension_numbers<[1], [0], [0], [1], [0, 0, 1, 1], [], []>} : vector<2x32xbf16>, vector<32x32xbf16>, vector<2x32xf32> -> vector<2x32xf32>
    %cst_72 = arith.constant dense<0.000000e+00> : vector<2x32xf32>
    %233 = tpu.matmul %230, %13, %cst_72 {dimension_numbers = #tpu.dot_dimension_numbers<[1], [0], [0], [1], [0, 0, 1, 1], [], []>} : vector<2x32xbf16>, vector<32x32xbf16>, vector<2x32xf32> -> vector<2x32xf32>
    %234 = vector.extract_strided_slice %29 {offsets = [2, 0], sizes = [2, 32], strides = [1, 1]} : vector<16x32xf32> to vector<2x32xf32>
    %235 = arith.addf %234, %231 : vector<2x32xf32>
    %236 = arith.negf %235 : vector<2x32xf32>
    %237 = math.exp %236 : vector<2x32xf32>
    %cst_73 = arith.constant 1.000000e+00 : f32
    %238 = vector.broadcast %cst_73 : f32 to vector<2x32xf32>
    %239 = arith.addf %238, %237 : vector<2x32xf32>
    %240 = arith.divf %238, %239 : vector<2x32xf32>
    %241 = vector.extract_strided_slice %33 {offsets = [2, 0], sizes = [2, 32], strides = [1, 1]} : vector<16x32xf32> to vector<2x32xf32>
    %242 = arith.addf %241, %232 : vector<2x32xf32>
    %243 = arith.negf %242 : vector<2x32xf32>
    %244 = math.exp %243 : vector<2x32xf32>
    %cst_74 = arith.constant 1.000000e+00 : f32
    %245 = vector.broadcast %cst_74 : f32 to vector<2x32xf32>
    %246 = arith.addf %245, %244 : vector<2x32xf32>
    %247 = arith.divf %245, %246 : vector<2x32xf32>
    %248 = vector.extract_strided_slice %36 {offsets = [2, 0], sizes = [2, 32], strides = [1, 1]} : vector<16x32xf32> to vector<2x32xf32>
    %249 = vector.broadcast %25 : vector<1x32xf32> to vector<2x32xf32>
    %250 = arith.addf %233, %249 : vector<2x32xf32>
    %251 = arith.mulf %240, %250 : vector<2x32xf32>
    %252 = arith.addf %248, %251 : vector<2x32xf32>
    %253 = math.tanh %252 : vector<2x32xf32>
    %254 = arith.subf %229, %253 : vector<2x32xf32>
    %255 = arith.mulf %247, %254 : vector<2x32xf32>
    %256 = arith.addf %253, %255 : vector<2x32xf32>
    %c1_i32 = arith.constant 1 : i32
    %257 = vector.broadcast %c1_i32 : i32 to vector<2x1xi32>
    %258 = arith.cmpi sgt, %1, %257 : vector<2x1xi32>
    %259 = vector.shape_cast %258 : vector<2x1xi1> to vector<2x1xi1>
    %260 = vector.broadcast %259 : vector<2x1xi1> to vector<2x32xi1>
    %261 = arith.select %260, %256, %229 : vector<2x32xi1>, vector<2x32xf32>
    %262 = arith.truncf %261 : vector<2x32xf32> to vector<2x32xbf16>
    %cst_75 = arith.constant dense<0.000000e+00> : vector<2x32xf32>
    %263 = tpu.matmul %262, %9, %cst_75 {dimension_numbers = #tpu.dot_dimension_numbers<[1], [0], [0], [1], [0, 0, 1, 1], [], []>} : vector<2x32xbf16>, vector<32x32xbf16>, vector<2x32xf32> -> vector<2x32xf32>
    %cst_76 = arith.constant dense<0.000000e+00> : vector<2x32xf32>
    %264 = tpu.matmul %262, %11, %cst_76 {dimension_numbers = #tpu.dot_dimension_numbers<[1], [0], [0], [1], [0, 0, 1, 1], [], []>} : vector<2x32xbf16>, vector<32x32xbf16>, vector<2x32xf32> -> vector<2x32xf32>
    %cst_77 = arith.constant dense<0.000000e+00> : vector<2x32xf32>
    %265 = tpu.matmul %262, %13, %cst_77 {dimension_numbers = #tpu.dot_dimension_numbers<[1], [0], [0], [1], [0, 0, 1, 1], [], []>} : vector<2x32xbf16>, vector<32x32xbf16>, vector<2x32xf32> -> vector<2x32xf32>
    %266 = vector.extract_strided_slice %29 {offsets = [0, 0], sizes = [2, 32], strides = [1, 1]} : vector<16x32xf32> to vector<2x32xf32>
    %267 = arith.addf %266, %263 : vector<2x32xf32>
    %268 = arith.negf %267 : vector<2x32xf32>
    %269 = math.exp %268 : vector<2x32xf32>
    %cst_78 = arith.constant 1.000000e+00 : f32
    %270 = vector.broadcast %cst_78 : f32 to vector<2x32xf32>
    %271 = arith.addf %270, %269 : vector<2x32xf32>
    %272 = arith.divf %270, %271 : vector<2x32xf32>
    %273 = vector.extract_strided_slice %33 {offsets = [0, 0], sizes = [2, 32], strides = [1, 1]} : vector<16x32xf32> to vector<2x32xf32>
    %274 = arith.addf %273, %264 : vector<2x32xf32>
    %275 = arith.negf %274 : vector<2x32xf32>
    %276 = math.exp %275 : vector<2x32xf32>
    %cst_79 = arith.constant 1.000000e+00 : f32
    %277 = vector.broadcast %cst_79 : f32 to vector<2x32xf32>
    %278 = arith.addf %277, %276 : vector<2x32xf32>
    %279 = arith.divf %277, %278 : vector<2x32xf32>
    %280 = vector.extract_strided_slice %36 {offsets = [0, 0], sizes = [2, 32], strides = [1, 1]} : vector<16x32xf32> to vector<2x32xf32>
    %281 = vector.broadcast %25 : vector<1x32xf32> to vector<2x32xf32>
    %282 = arith.addf %265, %281 : vector<2x32xf32>
    %283 = arith.mulf %272, %282 : vector<2x32xf32>
    %284 = arith.addf %280, %283 : vector<2x32xf32>
    %285 = math.tanh %284 : vector<2x32xf32>
    %286 = arith.subf %261, %285 : vector<2x32xf32>
    %287 = arith.mulf %279, %286 : vector<2x32xf32>
    %288 = arith.addf %285, %287 : vector<2x32xf32>
    %c0_i32 = arith.constant 0 : i32
    %289 = vector.broadcast %c0_i32 : i32 to vector<2x1xi32>
    %290 = arith.cmpi sgt, %1, %289 : vector<2x1xi32>
    %291 = vector.shape_cast %290 : vector<2x1xi1> to vector<2x1xi1>
    %292 = vector.broadcast %291 : vector<2x1xi1> to vector<2x32xi1>
    %293 = arith.select %292, %288, %261 : vector<2x32xi1>, vector<2x32xf32>
    %c0_80 = arith.constant 0 : index
    %c0_81 = arith.constant 0 : index
    %294 = vector.load %arg6[%c0_80, %c0_81] : memref<32x4xf32, #tpu.memory_space<vmem>>, vector<32x4xf32>
    %cst_82 = arith.constant dense<0.000000e+00> : vector<2x4xf32>
    %295 = tpu.matmul %293, %294, %cst_82 {dimension_numbers = #tpu.dot_dimension_numbers<[1], [0], [0], [1], [0, 0, 1, 1], [], []>} : vector<2x32xf32>, vector<32x4xf32>, vector<2x4xf32> -> vector<2x4xf32>
    %c0_83 = arith.constant 0 : index
    %c0_84 = arith.constant 0 : index
    %296 = vector.load %arg7[%c0_83, %c0_84] : memref<1x4xf32, #tpu.memory_space<vmem>>, vector<1x4xf32>
    %297 = vector.broadcast %296 : vector<1x4xf32> to vector<2x4xf32>
    %298 = arith.addf %295, %297 : vector<2x4xf32>
    %cst_85 = arith.constant dense<0xFF800000> : vector<2xf32>
    %299 = vector.multi_reduction <maximumf>, %298, %cst_85 [1] : vector<2x4xf32> to vector<2xf32>
    %300 = vector.shape_cast %299 : vector<2xf32> to vector<2x1xf32>
    %301 = vector.broadcast %300 : vector<2x1xf32> to vector<2x4xf32>
    %302 = arith.subf %298, %301 : vector<2x4xf32>
    %303 = math.exp %302 : vector<2x4xf32>
    %cst_86 = arith.constant dense<0.000000e+00> : vector<2xf32>
    %304 = vector.multi_reduction <add>, %303, %cst_86 [1] : vector<2x4xf32> to vector<2xf32>
    %305 = vector.shape_cast %304 : vector<2xf32> to vector<2x1xf32>
    %306 = math.log %305 : vector<2x1xf32>
    %307 = arith.addf %306, %300 : vector<2x1xf32>
    %308 = vector.broadcast %307 : vector<2x1xf32> to vector<2x4xf32>
    %309 = arith.subf %298, %308 : vector<2x4xf32>
    %c0_87 = arith.constant 0 : index
    %c0_88 = arith.constant 0 : index
    %310 = vector.load %arg8[%c0_87, %c0_88] : memref<2x4xf32, #tpu.memory_space<vmem>>, vector<2x4xf32>
    tpu.vector_store %arg8[%c0_87, %c0_88], %309 {strides = array<i32>} : memref<2x4xf32, #tpu.memory_space<vmem>>, vector<2x4xf32>,
    return
  }
}

</mosaic_0001>

<bundles_post_ra>
// kernel: tpu_custom_call.1
= control target key start
LH: loop header
LB: loop body
LE: loop exit
PB: predicated region body
PF: predicated region fallthrough
CT: control target
= control target key end

     0   :  { %13 = vsyncpa [#allocation3], 0  ;;  %s1687_s0 = inlined_call_operand.vmem [shape: bf16[16,16], index: 0, kind: input, shape index: {}]   ;;  %s1688_s1 = inlined_call_operand.vmem [shape: s32[2,1], index: 1, kind: input, shape index: {}]   ;;  %s1689_s2 = inlined_call_operand.vmem [shape: bf16[3,16,32], index: 2, kind: input, shape index: {}]   ;;  %s1690_s3 = inlined_call_operand.hbm [shape: bf16[3,32,32], index: 3, kind: input, shape index: {}]   ;;  %s1691_s4 = inlined_call_operand.vmem [shape: f32[3,1,32], index: 4, kind: input, shape index: {}]   ;;  %s1692_s5 = inlined_call_operand.vmem [shape: f32[3,1,32], index: 5, kind: input, shape index: {}]   ;;  %s1693_s6 = inlined_call_operand.vmem [shape: f32[32,4], index: 6, kind: input, shape index: {}]   ;;  %s1694_s7 = inlined_call_operand.vmem [shape: f32[1,4], index: 7, kind: input, shape index: {}]   ;;  %s1695_s8 = inlined_call_operand.hbm [shape: f32[2,4], index: 8, kind: output, shape index: {}]  }
   0x1   :  { %14 = vsyncpa [#allocation4], 0  ;;  %s25_s29 = sshll.u32 %s1690_s3, 4  ;;  %s1381_s30 = smov [#allocation2]   ;;  %s26_s29 = int_to_ptr.hbm [resolvable:$true] %s25_s29 }
   0x2   :  { %s27_s9 = sshll.u32 %s1381_s30, 4  ;;  %s1382_s10 = smov 64   ;;  %s28_s9 = int_to_ptr.vmem [resolvable:$true] %s27_s9 }
   0x3   :  { %s1383_s11 = smov 4  }
   0x4   :  { %33 = dma.hbm_to_vmem [thread:$0]  %s26_s29, 768, %s28_s9, [#allocation3], %s1382_s10, %s1382_s10, %s1383_s11  }
   0x5   :  { %1377 = dma.done.wait [#allocation3], 768  }
   0x6   :  { %1378 = vsyncadd [#allocation3], 4294966528  ;;  %v1384_v0 = vmov 0   ;;  %v1224_v1 = vld [vmem:[%s1689_s2] sm:$0xff]  ;;  %v1440_v2 = vld [vmem:[#allocation2 + $0x8] sm:$0xff]  ;;  %vm97_vm0 = vcmask 130048  }
   0x7   :  { %1238 = vset.pattern.permute.xlu0 %v1384_v0  ;;  %1239 = vset.pattern.permute.xlu1 %v1384_v0  ;;  %v1223_v3 = vld [vmem:[%s1687_s0] sm:$0xff]  ;;  %v1225_v4 = vld [vmem:[%s1689_s2 + $0x8] sm:$0xff]  ;;  %v1448_v5 = vld [vmem:[#allocation2 + $0x18] sm:$0xff]  ;;  %vm174_vm13 = vcmask 261120   ;;  %s1385_s16 = smov [#allocation5]   ;;  %s1124_s0 = sshll.u32 %s1695_s8, 4  ;;  %s1125_s0 = int_to_ptr.hbm [resolvable:$true] %s1124_s0 }
   0x8   :  { %1240 = vset.pattern.permute.xlu2 %v1384_v0  ;;  %108 = vmatpush.bf16.msra.mxu0 %v1224_v1  ;;  %v1451_v6 = vld [vmem:[#allocation2] sm:$0xff]  ;;  %v1226_v7 = vld [vmem:[%s1689_s2 + $0x10] sm:$0xff]  ;;  %v1456_v8 = vld [vmem:[#allocation2 + $0x28] sm:$0xff] }
   0x9   :  { %184 = vmatpush.bf16.msra.mxu3 %v1440_v2  ;;  %132 = vmatpush.bf16.msra.mxu1 %v1225_v4  ;;  %v1459_v9 = vld [vmem:[#allocation2 + $0x10] sm:$0xff]  ;;  %v1464_v10 = vld [vmem:[%s1688_s1] sm:$0x3]  ;;  %v1241_v27 = vld [vmem:[%s1691_s4 + $0x2] ss:$0 sm:$0xff] }
   0xa   :  { %155 = vmatpush.bf16.msra.mxu2 %v1226_v7  ;;  %v1467_v11 = vld [vmem:[#allocation2 + $0x20] sm:$0xff]  ;;  %vm299_vm1 = vcmp.gt.s32.totalorder %v1464_v10, 7  ;;  %vm413_vm2 = vcmp.gt.s32.totalorder %v1464_v10, 6  ;;  %vm965_vm3 = vcmp.gt.s32.totalorder %v1464_v10, 1  ;;  %vm527_vm15 = vcmp.gt.s32.totalorder %v1464_v10, 5 }
   0xb   :  { %1150 = vmatmul.msk.bf16.vlgmr.msra.gmra.mxu0 %vm97_vm0, %v1223_v3  ;;  %v300_v12 = vsel %vm299_vm1, 1, %v1384_v0  ;;  %v414_v13 = vsel %vm413_vm2, 1, %v1384_v0  ;;  %v966_v14 = vsel %vm965_vm3, 1, %v1384_v0  ;;  %v72_v15 = vld [vmem:[%s1691_s4] sm:$0x1]  ;;  %vm626_vm3 = vcmp.gt.s32.totalorder %v1464_v10, 4 }
   0xc   :  { %209 = vmatpush.bf16.msrb.mxu0 %v1448_v5  ;;  %1155 = vmatmul.msk.bf16.vlgmr.msra.gmra.mxu1 %vm97_vm0, %v1223_v3  ;;  %v77_v16 = vld [vmem:[%s1692_s5] sm:$0x1]  ;;  %v1138_v17 = vld [vmem:[%s1691_s4 + $0x1] sm:$0x1]  ;;  %v1530_v50 = vld [vmem:[%s1692_s5 + $0x2] ss:$0 sm:$0xff] }
   0xd   :  { %283 = vmatpush.bf16.msrb.mxu1 %v1456_v8  ;;  %185 = vmatpush.bf16.msra.mxu3 %v1451_v6  ;;  %v1140_v18 = vld [vmem:[%s1692_s5 + $0x1] sm:$0x1]  ;;  %v82_v19 = vadd.f32 %v77_v16, %v72_v15 }
   0xe   :  { %319 = vmatpush.bf16.msrb.mxu2 %v1440_v2  ;;  %302 = vperm.xlu0 %1238, %v300_v12   ;;  %v115_v20 = vadd.f32 %v1140_v18, %v1138_v17 }
   0xf   :  { %1160 = vmatmul.msk.bf16.vlgmr.msra.gmra.mxu2 %vm97_vm0, %v1223_v3  ;;  %v84_v21 = vperm.slane %v82_v19, 0 }
  0x10   :  { %210 = vmatpush.bf16.msrb.mxu0 %v1459_v9  ;;  %186 = vmatmul.bf16.vlgmr.msra.gmra.mxu3 %v1384_v0  ;;  %v117_v22 = vperm.slane %v115_v20, 0 }
  0x11   :  { %284 = vmatpush.bf16.msrb.mxu1 %v1467_v11  ;;  %332 = vmatpush.bf16.msrb.mxu3 %v1448_v5 }
  0x12   :  { %320 = vmatpush.bf16.msrb.mxu2 %v1451_v6 }
  0x14   :  { %391 = vmatpush.bf16.msra.mxu0 %v1456_v8 }
  0x15   :  { %433 = vmatpush.bf16.msra.mxu1 %v1440_v2  ;;  %333 = vmatpush.bf16.msrb.mxu3 %v1459_v9 }
  0x16   :  { %446 = vmatpush.bf16.msra.mxu2 %v1448_v5  ;;  %416 = vperm.xlu0 %1238, %v414_v13  }
  0x18   :  { %392 = vmatpush.bf16.msra.mxu0 %v1467_v11 }
  0x19   :  { %434 = vmatpush.bf16.msra.mxu1 %v1451_v6  ;;  %505 = vmatpush.bf16.msra.mxu3 %v1456_v8 }
  0x1a   :  { %447 = vmatpush.bf16.msra.mxu2 %v1459_v9 }
  0x1b   :  { %211 = vmatmul.bf16.vlgmr.msrb.gmra.mxu0 %v1384_v0 }
  0x1c   :  { %285 = vmatmul.bf16.vlgmr.msrb.gmra.mxu1 %v1384_v0  ;;  %547 = vmatpush.bf16.msrb.mxu0 %v1440_v2 }
  0x1d   :  { %506 = vmatpush.bf16.msra.mxu3 %v1467_v11  ;;  %560 = vmatpush.bf16.msrb.mxu1 %v1448_v5 }
  0x1e   :  { %968 = vperm.xlu0 %1238, %v966_v14  }
  0x20   :  { %548 = vmatpush.bf16.msrb.mxu0 %v1451_v6 }
  0x21   :  { %561 = vmatpush.bf16.msrb.mxu1 %v1459_v9 }
  0x88   :  { %v110_v23 = vpop.f32.mrf.mxu0 }
  0x89   :  { %v1512_v24 = vadd.f32 %v110_v23, %v84_v21  ;;  %v134_v25 = vpop.f32.mrf.mxu1 }
  0x8a   :  { %v1514_v26 = vadd.f32 %v134_v25, %v117_v22  ;;  %v303_v25 = vpop.permute.xlu0 %302 }
  0x8b   :  { %vm304_vm12 = vcmp.eq.s32.totalorder %v303_v25, 1 }
  0x90   :  { %v112_v28 = vpop.f32.mrf.mxu0 }
  0x91   :  { %v136_v30 = vpop.f32.mrf.mxu1  ;;  %v1521_v33 = vadd.f32 %v112_v28, %v84_v21 }
  0x92   :  { %v157_v29 = vpop.f32.mrf.mxu2  ;;  %v1524_v37 = vadd.f32 %v136_v30, %v117_v22 }
  0x93   :  { %v1519_v31 = vadd.f32 %v1241_v27, %v157_v29  ;;  %v187_v32 = vpop.f32.mrf.mxu3 }
  0x94   :  { %v217_v34 = vrot.slane %v187_v32, 2 }
  0x96   :  { %v219_v35 = vadd.f32 %v217_v34, %v1521_v33 }
  0x98   :  { %v1177_v36 = vmul.f32 -1.442695, %v219_v35  ;;  %v212_v38 = vpop.f32.mrf.mxu0 }
  0x99   :  { %v240_v39 = vrot.slane %v212_v38, 2  ;;  %v286_v40 = vpop.f32.mrf.mxu1 }
  0x9a   :  { %1244 = vpow2.f32 %v1177_v36  ;;  %v287_v54 = vadd.f32 %v1530_v50, %v286_v40  ;;  %v159_v63 = vpop.f32.mrf.mxu2 }
  0x9b   :  { %v189_v41 = vpop.f32.mrf.mxu3  ;;  %v242_v42 = vadd.f32 %v240_v39, %v1524_v37  ;;  %v1533_v12 = vadd.f32 %v1241_v27, %v159_v63 }
  0x9c   :  { %v291_v61 = vrot.slane %v287_v54, 2 }
  0x9d   :  { %v1178_v43 = vmul.f32 -1.442695, %v242_v42 }
  0x9f   :  { %1246 = vpow2.f32 %v1178_v43 }
  0xa0   :  { %v1245_v44 = vpop.eup %1244  ;;  %v214_v46 = vpop.f32.mrf.mxu0 }
  0xa1   :  { %v223_v45 = vadd.f32 1.0, %v1245_v44  ;;  %v288_v47 = vpop.f32.mrf.mxu1 }
  0xa3   :  { %1248 = vrcp.f32 %v223_v45  ;;  %v235_v55 = vand.u32 2147483648, %v223_v45  ;;  %v233_v57 = vand.u32 2147483647, %v223_v45  ;;  %vm229_vm5 = vweird.f32 %v223_v45 }
  0xa5   :  { %v1247_v48 = vpop.eup %1246  ;;  %v236_v62 = vor.u32 1.1754944e-38, %v235_v55  ;;  %vm234_vm7 = vcmp.eq.f32.partialorder %v233_v57, 8.507059e+37 }
  0xa6   :  { %v246_v49 = vadd.f32 1.0, %v1247_v48 }
  0xa8   :  { %1250 = vrcp.f32 %v246_v49  ;;  %v258_v16 = vand.u32 2147483648, %v246_v49  ;;  %vm252_vm9 = vweird.f32 %v246_v49  ;;  %v256_v17 = vand.u32 2147483647, %v246_v49 }
  0xa9   :  { %v1249_v51 = vpop.eup %1248 }
  0xaa   :  { %v225_v52 = vmul.f32 %v1249_v51, %v223_v45  ;;  %vm230_vm4 = vweird.f32 %v1249_v51  ;;  %v259_v20 = vor.u32 1.1754944e-38, %v258_v16  ;;  %vm257_vm11 = vcmp.eq.f32.partialorder %v256_v17, 8.507059e+37 }
  0xab   :  { %vm231_vm6 = vmor %vm229_vm5, %vm230_vm4  ;;  %vm1064_vm4 = vcmp.gt.s32.totalorder %v1464_v10, 0 }
  0xac   :  { %v226_v53 = vsub.f32 1.0, %v225_v52 }
  0xae   :  { %v227_v56 = vmul.f32 %v1249_v51, %v226_v53  ;;  %v1251_v58 = vpop.eup %1250 }
  0xaf   :  { %v248_v59 = vmul.f32 %v1251_v58, %v246_v49  ;;  %vm253_vm8 = vweird.f32 %v1251_v58 }
  0xb0   :  { %v228_v60 = vadd.f32 %v1249_v51, %v227_v56  ;;  %vm254_vm10 = vmor %vm252_vm9, %vm253_vm8 }
  0xb1   :  { %v249_v3 = vsub.f32 1.0, %v248_v59 }
  0xb2   :  { %v232_v1 = vsel %vm231_vm6, %v1249_v51, %v228_v60  ;;  %v528_v60 = vsel %vm527_vm15, 1, %v1384_v0 }
  0xb3   :  { %v237_v4 = vsel %vm234_vm7, %v236_v62, %v232_v1  ;;  %v250_v13 = vmul.f32 %v1251_v58, %v249_v3  ;;  %530 = vperm.xlu1 %1239, %v528_v60  }
  0xb4   :  { %v293_v7 = vmul.f32 %v291_v61, %v237_v4 }
  0xb5   :  { %v251_v15 = vadd.f32 %v1251_v58, %v250_v13 }
  0xb6   :  { %v294_v14 = vadd.f32 %v293_v7, %v1533_v12 }
  0xb7   :  { %v255_v18 = vsel %vm254_vm10, %v1251_v58, %v251_v15 }
  0xb8   :  { %1252 = vtanh.f32 %v294_v14  ;;  %v260_v22 = vsel %vm257_vm11, %v259_v20, %v255_v18  ;;  %v627_v14 = vsel %vm626_vm3, 1, %v1384_v0 }
  0xbb   :  { %629 = vperm.xlu1 %1239, %v627_v14  }
  0xbe   :  { %v1253_v19 = vpop.eup %1252 }
  0xbf   :  { %v296_v21 = vsub.f32 0.0, %v1253_v19 }
  0xc1   :  { %v297_v23 = vmul.f32 %v296_v21, %v260_v22 }
  0xc3   :  { %v298_v27 = vadd.f32 %v1253_v19, %v297_v23  ;;  %v1065_v19 = vsel %vm1064_vm4, 1, %v1384_v0  ;;  %vm737_vm4 = vcmp.gt.s32.totalorder %v1464_v10, 3 }
  0xc4   :  { %1067 = vperm.xlu1 %1239, %v1065_v19  }
  0xc5   :  { %v306_v28 = vrot.slane %v298_v27, 6 }
  0xc7   :  { %v1536_v29 = vsel %vm304_vm12, %v306_v28, 0.0 }
  0xc8   :  { %v309_v30 = vpack.c.bf16 %v1536_v29, %v1536_v29 }
  0xca   :  { %1187 = vmatmul.msk.bf16.vlgmr.msrb.gmra.mxu2 %vm174_vm13, %v309_v30  ;;  %1188 = vmatmul.msk.bf16.vlgmr.msrb.gmra.mxu3 %vm174_vm13, %v309_v30 }
  0xcb   :  { %1191 = vmatmul.msk.bf16.vlgmr.msra.gmra.mxu0 %vm174_vm13, %v309_v30  ;;  %613 = vmatpush.bf16.msrb.mxu2 %v1456_v8 }
  0xcc   :  { %643 = vmatpush.bf16.msrb.mxu3 %v1440_v2  ;;  %656 = vmatpush.bf16.msra.mxu0 %v1448_v5 }
  0xcf   :  { %614 = vmatpush.bf16.msrb.mxu2 %v1467_v11 }
  0xd0   :  { %644 = vmatpush.bf16.msrb.mxu3 %v1451_v6  ;;  %657 = vmatpush.bf16.msra.mxu0 %v1459_v9 }
 0x148   :  { %v394_v32 = vpop.f32.mrf.mxu0 }
 0x149   :  { %v395_v56 = vadd.f32 %v1530_v50, %v394_v32 }
 0x14b   :  { %v399_v63 = vrot.slane %v395_v56, 4 }
 0x14d   :  { %v322_v34 = vpop.f32.mrf.mxu2  ;;  %v335_v35 = vpop.f32.mrf.mxu3 }
 0x14e   :  { %v340_v36 = vrot.slane %v322_v34, 4  ;;  %v363_v38 = vrot.slane %v335_v35, 4  ;;  %v417_v34 = vpop.permute.xlu0 %416 }
 0x14f   :  { %vm418_vm9 = vcmp.eq.s32.totalorder %v417_v34, 1  ;;  %v531_v34 = vpop.permute.xlu1 %530 }
 0x150   :  { %v342_v39 = vadd.f32 %v340_v36, %v1521_v33  ;;  %v365_v40 = vadd.f32 %v363_v38, %v1524_v37  ;;  %v396_v41 = vpop.f32.mrf.mxu0  ;;  %vm532_vm3 = vcmp.eq.s32.totalorder %v531_v34, 1 }
 0x152   :  { %v1189_v42 = vmul.f32 -1.442695, %v342_v39  ;;  %v1190_v43 = vmul.f32 -1.442695, %v365_v40 }
 0x154   :  { %1254 = vpow2.f32 %v1189_v42 }
 0x155   :  { %1256 = vpow2.f32 %v1190_v43  ;;  %v324_v44 = vpop.f32.mrf.mxu2  ;;  %v337_v45 = vpop.f32.mrf.mxu3 }
 0x15a   :  { %v1255_v46 = vpop.eup %1254 }
 0x15b   :  { %v1257_v47 = vpop.eup %1256  ;;  %v346_v48 = vadd.f32 1.0, %v1255_v46 }
 0x15c   :  { %v369_v49 = vadd.f32 1.0, %v1257_v47 }
 0x15d   :  { %1258 = vrcp.f32 %v346_v48  ;;  %v358_v54 = vand.u32 2147483648, %v346_v48  ;;  %v356_v58 = vand.u32 2147483647, %v346_v48  ;;  %vm352_vm0 = vweird.f32 %v346_v48 }
 0x15e   :  { %1260 = vrcp.f32 %v369_v49  ;;  %v381_v18 = vand.u32 2147483648, %v369_v49  ;;  %vm375_vm6 = vweird.f32 %v369_v49  ;;  %v379_v20 = vand.u32 2147483647, %v369_v49 }
 0x15f   :  { %v359_v61 = vor.u32 1.1754944e-38, %v358_v54  ;;  %vm357_vm2 = vcmp.eq.f32.partialorder %v356_v58, 8.507059e+37 }
 0x160   :  { %v382_v25 = vor.u32 1.1754944e-38, %v381_v18  ;;  %vm380_vm8 = vcmp.eq.f32.partialorder %v379_v20, 8.507059e+37 }
 0x163   :  { %v1259_v51 = vpop.eup %1258 }
 0x164   :  { %v348_v52 = vmul.f32 %v1259_v51, %v346_v48  ;;  %v1261_v55 = vpop.eup %1260  ;;  %vm353_vm14 = vweird.f32 %v1259_v51 }
 0x165   :  { %vm354_vm1 = vmor %vm352_vm0, %vm353_vm14  ;;  %v371_v62 = vmul.f32 %v1261_v55, %v369_v49  ;;  %vm376_vm5 = vweird.f32 %v1261_v55 }
 0x166   :  { %v349_v53 = vsub.f32 1.0, %v348_v52  ;;  %vm377_vm7 = vmor %vm375_vm6, %vm376_vm5  ;;  %vm851_vm5 = vcmp.gt.s32.totalorder %v1464_v10, 2 }
 0x167   :  { %v372_v7 = vsub.f32 1.0, %v371_v62 }
 0x168   :  { %v350_v57 = vmul.f32 %v1259_v51, %v349_v53 }
 0x169   :  { %v373_v15 = vmul.f32 %v1261_v55, %v372_v7 }
 0x16a   :  { %v351_v59 = vadd.f32 %v1259_v51, %v350_v57 }
 0x16b   :  { %v374_v16 = vadd.f32 %v1261_v55, %v373_v15 }
 0x16c   :  { %v355_v1 = vsel %vm354_vm1, %v1259_v51, %v351_v59 }
 0x16d   :  { %v360_v3 = vsel %vm357_vm2, %v359_v61, %v355_v1  ;;  %v378_v22 = vsel %vm377_vm7, %v1261_v55, %v374_v16 }
 0x16e   :  { %v401_v4 = vmul.f32 %v399_v63, %v360_v3  ;;  %v383_v28 = vsel %vm380_vm8, %v382_v25, %v378_v22 }
 0x170   :  { %v402_v13 = vadd.f32 %v401_v4, %v1533_v12 }
 0x172   :  { %1262 = vtanh.f32 %v402_v13 }
 0x178   :  { %v1263_v17 = vpop.eup %1262 }
 0x179   :  { %v405_v21 = vrot.slane %v1263_v17, 4 }
 0x17b   :  { %v407_v23 = vsub.f32 %v1536_v29, %v405_v21 }
 0x17d   :  { %v409_v27 = vrot.slane %v407_v23, 4 }
 0x17f   :  { %v411_v30 = vmul.f32 %v409_v27, %v383_v28 }
 0x181   :  { %v412_v32 = vadd.f32 %v1263_v17, %v411_v30 }
 0x183   :  { %v420_v35 = vrot.slane %v412_v32, 4 }
 0x185   :  { %v1561_v36 = vsel %vm418_vm9, %v420_v35, %v1536_v29 }
 0x186   :  { %v423_v38 = vpack.c.bf16 %v1561_v36, %v1561_v36 }
 0x188   :  { %1192 = vmatmul.msk.bf16.vlgmr.msra.gmra.mxu1 %vm174_vm13, %v423_v38  ;;  %1193 = vmatmul.msk.bf16.vlgmr.msra.gmra.mxu2 %vm174_vm13, %v423_v38 }
 0x189   :  { %1196 = vmatmul.msk.bf16.vlgmr.msra.gmra.mxu3 %vm174_vm13, %v423_v38  ;;  %715 = vmatpush.bf16.msra.mxu1 %v1456_v8 }
 0x18a   :  { %757 = vmatpush.bf16.msra.mxu2 %v1440_v2  ;;  %770 = vmatpush.bf16.msra.mxu3 %v1448_v5 }
 0x18d   :  { %716 = vmatpush.bf16.msra.mxu1 %v1467_v11 }
 0x18e   :  { %758 = vmatpush.bf16.msra.mxu2 %v1451_v6  ;;  %771 = vmatpush.bf16.msra.mxu3 %v1459_v9 }
 0x205   :  { %v436_v29 = vpop.f32.mrf.mxu1 }
 0x206   :  { %v454_v39 = vrot.slane %v436_v29, 6 }
 0x208   :  { %v456_v40 = vadd.f32 %v454_v39, %v1521_v33 }
 0x20a   :  { %v1194_v41 = vmul.f32 -1.442695, %v456_v40 }
 0x20b   :  { %v449_v42 = vpop.f32.mrf.mxu2 }
 0x20c   :  { %1264 = vpow2.f32 %v1194_v41  ;;  %v477_v43 = vrot.slane %v449_v42, 6  ;;  %v508_v44 = vpop.f32.mrf.mxu3 }
 0x20d   :  { %v438_v45 = vpop.f32.mrf.mxu1  ;;  %v509_v61 = vadd.f32 %v1530_v50, %v508_v44 }
 0x20e   :  { %v479_v46 = vadd.f32 %v477_v43, %v1524_v37 }
 0x20f   :  { %v513_v7 = vrot.slane %v509_v61, 6 }
 0x210   :  { %v1195_v47 = vmul.f32 -1.442695, %v479_v46 }
 0x212   :  { %v1265_v48 = vpop.eup %1264  ;;  %1266 = vpow2.f32 %v1195_v47 }
 0x213   :  { %v460_v49 = vadd.f32 1.0, %v1265_v48  ;;  %v451_v51 = vpop.f32.mrf.mxu2 }
 0x214   :  { %v510_v52 = vpop.f32.mrf.mxu3 }
 0x215   :  { %1268 = vrcp.f32 %v460_v49  ;;  %v472_v58 = vand.u32 2147483648, %v460_v49  ;;  %v470_v60 = vand.u32 2147483647, %v460_v49  ;;  %vm466_vm11 = vweird.f32 %v460_v49 }
 0x217   :  { %v473_v3 = vor.u32 1.1754944e-38, %v472_v58  ;;  %vm471_vm14 = vcmp.eq.f32.partialorder %v470_v60, 8.507059e+37 }
 0x218   :  { %v1267_v53 = vpop.eup %1266 }
 0x219   :  { %v483_v54 = vadd.f32 1.0, %v1267_v53 }
 0x21b   :  { %v1269_v55 = vpop.eup %1268  ;;  %1270 = vrcp.f32 %v483_v54  ;;  %v495_v20 = vand.u32 2147483648, %v483_v54  ;;  %vm489_vm0 = vweird.f32 %v483_v54  ;;  %v493_v22 = vand.u32 2147483647, %v483_v54 }
 0x21c   :  { %v462_v56 = vmul.f32 %v1269_v55, %v460_v49  ;;  %vm467_vm10 = vweird.f32 %v1269_v55 }
 0x21d   :  { %vm468_vm12 = vmor %vm466_vm11, %vm467_vm10  ;;  %v496_v27 = vor.u32 1.1754944e-38, %v495_v20  ;;  %vm494_vm2 = vcmp.eq.f32.partialorder %v493_v22, 8.507059e+37 }
 0x21e   :  { %v463_v57 = vsub.f32 1.0, %v462_v56 }
 0x220   :  { %v464_v59 = vmul.f32 %v1269_v55, %v463_v57 }
 0x221   :  { %v1271_v62 = vpop.eup %1270 }
 0x222   :  { %v465_v63 = vadd.f32 %v1269_v55, %v464_v59  ;;  %v485_v1 = vmul.f32 %v1271_v62, %v483_v54  ;;  %vm490_vm15 = vweird.f32 %v1271_v62 }
 0x223   :  { %vm491_vm1 = vmor %vm489_vm0, %vm490_vm15 }
 0x224   :  { %v469_v4 = vsel %vm468_vm12, %v1269_v55, %v465_v63  ;;  %v486_v15 = vsub.f32 1.0, %v485_v1 }
 0x225   :  { %v474_v13 = vsel %vm471_vm14, %v473_v3, %v469_v4 }
 0x226   :  { %v515_v14 = vmul.f32 %v513_v7, %v474_v13  ;;  %v487_v17 = vmul.f32 %v1271_v62, %v486_v15 }
 0x228   :  { %v516_v16 = vadd.f32 %v515_v14, %v1533_v12  ;;  %v488_v18 = vadd.f32 %v1271_v62, %v487_v17 }
 0x22a   :  { %1272 = vtanh.f32 %v516_v16  ;;  %v492_v23 = vsel %vm491_vm1, %v1271_v62, %v488_v18  ;;  %v852_v62 = vsel %vm851_vm5, 1, %v1384_v0 }
 0x22b   :  { %v497_v30 = vsel %vm494_vm2, %v496_v27, %v492_v23  ;;  %v630_v23 = vpop.permute.xlu1 %629 }
 0x22c   :  { %vm631_vm15 = vcmp.eq.s32.totalorder %v630_v23, 1 }
 0x230   :  { %v1273_v19 = vpop.eup %1272 }
 0x231   :  { %v519_v21 = vrot.slane %v1273_v19, 2 }
 0x233   :  { %v521_v25 = vsub.f32 %v1561_v36, %v519_v21 }
 0x235   :  { %v523_v28 = vrot.slane %v521_v25, 6 }
 0x237   :  { %v525_v32 = vmul.f32 %v523_v28, %v497_v30 }
 0x239   :  { %v526_v35 = vadd.f32 %v1273_v19, %v525_v32 }
 0x23b   :  { %v534_v38 = vrot.slane %v526_v35, 2 }
 0x23d   :  { %v1580_v29 = vsel %vm532_vm3, %v534_v38, %v1561_v36 }
 0x23e   :  { %v537_v39 = vpack.c.bf16 %v1580_v29, %v1580_v29 }
 0x240   :  { %1197 = vmatmul.msk.bf16.vlgmr.msrb.gmra.mxu0 %vm174_vm13, %v537_v39  ;;  %1198 = vmatmul.msk.bf16.vlgmr.msrb.gmra.mxu1 %vm174_vm13, %v537_v39 }
 0x241   :  { %1201 = vmatmul.msk.bf16.vlgmr.msrb.gmra.mxu2 %vm174_vm13, %v537_v39  ;;  %829 = vmatpush.bf16.msrb.mxu0 %v1456_v8 }
 0x242   :  { %871 = vmatpush.bf16.msrb.mxu1 %v1440_v2  ;;  %884 = vmatpush.bf16.msrb.mxu2 %v1448_v5 }
 0x245   :  { %830 = vmatpush.bf16.msrb.mxu0 %v1467_v11 }
 0x246   :  { %872 = vmatpush.bf16.msrb.mxu1 %v1451_v6  ;;  %885 = vmatpush.bf16.msrb.mxu2 %v1459_v9 }
 0x2bd   :  { %v550_v36 = vpop.f32.mrf.mxu0  ;;  %v563_v40 = vpop.f32.mrf.mxu1 }
 0x2be   :  { %v567_v41 = vadd.f32 %v550_v36, %v1521_v33  ;;  %v587_v42 = vadd.f32 %v563_v40, %v1524_v37  ;;  %v738_v37 = vsel %vm737_vm4, 1, %v1384_v0 }
 0x2bf   :  { %740 = vperm.xlu2 %1240, %v738_v37  }
 0x2c0   :  { %v1199_v43 = vmul.f32 -1.442695, %v567_v41  ;;  %v1200_v44 = vmul.f32 -1.442695, %v587_v42 }
 0x2c2   :  { %1274 = vpow2.f32 %v1199_v43 }
 0x2c3   :  { %1276 = vpow2.f32 %v1200_v44 }
 0x2c4   :  { %v616_v45 = vpop.f32.mrf.mxu2 }
 0x2c5   :  { %v552_v46 = vpop.f32.mrf.mxu0  ;;  %v565_v47 = vpop.f32.mrf.mxu1  ;;  %v617_v4 = vadd.f32 %v1530_v50, %v616_v45 }
 0x2c7   :  { %854 = vperm.xlu2 %1240, %v852_v62  }
 0x2c8   :  { %v1275_v48 = vpop.eup %1274 }
 0x2c9   :  { %v1277_v49 = vpop.eup %1276  ;;  %v571_v51 = vadd.f32 1.0, %v1275_v48 }
 0x2ca   :  { %v591_v52 = vadd.f32 1.0, %v1277_v49 }
 0x2cb   :  { %1278 = vrcp.f32 %v571_v51  ;;  %v583_v58 = vand.u32 2147483648, %v571_v51  ;;  %v581_v60 = vand.u32 2147483647, %v571_v51  ;;  %vm577_vm7 = vweird.f32 %v571_v51 }
 0x2cc   :  { %1280 = vrcp.f32 %v591_v52  ;;  %v618_v53 = vpop.f32.mrf.mxu2  ;;  %v603_v16 = vand.u32 2147483648, %v591_v52  ;;  %vm597_vm11 = vweird.f32 %v591_v52  ;;  %v601_v17 = vand.u32 2147483647, %v591_v52 }
 0x2cd   :  { %v584_v1 = vor.u32 1.1754944e-38, %v583_v58  ;;  %vm582_vm9 = vcmp.eq.f32.partialorder %v581_v60, 8.507059e+37 }
 0x2ce   :  { %v604_v19 = vor.u32 1.1754944e-38, %v603_v16  ;;  %vm602_vm14 = vcmp.eq.f32.partialorder %v601_v17, 8.507059e+37 }
 0x2d1   :  { %v1279_v54 = vpop.eup %1278 }
 0x2d2   :  { %v1281_v33 = vpop.eup %1280  ;;  %v573_v55 = vmul.f32 %v1279_v54, %v571_v51  ;;  %vm578_vm6 = vweird.f32 %v1279_v54 }
 0x2d3   :  { %v593_v57 = vmul.f32 %v1281_v33, %v591_v52  ;;  %vm579_vm8 = vmor %vm577_vm7, %vm578_vm6  ;;  %vm598_vm10 = vweird.f32 %v1281_v33 }
 0x2d4   :  { %v574_v56 = vsub.f32 1.0, %v573_v55  ;;  %vm599_vm12 = vmor %vm597_vm11, %vm598_vm10 }
 0x2d5   :  { %v594_v63 = vsub.f32 1.0, %v593_v57 }
 0x2d6   :  { %v575_v59 = vmul.f32 %v1279_v54, %v574_v56 }
 0x2d7   :  { %v595_v14 = vmul.f32 %v1281_v33, %v594_v63 }
 0x2d8   :  { %v576_v61 = vadd.f32 %v1279_v54, %v575_v59 }
 0x2d9   :  { %v596_v15 = vadd.f32 %v1281_v33, %v595_v14 }
 0x2da   :  { %v580_v3 = vsel %vm579_vm8, %v1279_v54, %v576_v61 }
 0x2db   :  { %v585_v7 = vsel %vm582_vm9, %v584_v1, %v580_v3  ;;  %v600_v0 = vsel %vm599_vm12, %v1281_v33, %v596_v15 }
 0x2dc   :  { %v620_v13 = vmul.f32 %v617_v4, %v585_v7  ;;  %v605_v21 = vsel %vm602_vm14, %v604_v19, %v600_v0 }
 0x2de   :  { %v621_v10 = vadd.f32 %v620_v13, %v1533_v12 }
 0x2e0   :  { %1282 = vtanh.f32 %v621_v10 }
 0x2e6   :  { %v1283_v18 = vpop.eup %1282 }
 0x2e7   :  { %v623_v20 = vsub.f32 %v1580_v29, %v1283_v18 }
 0x2e9   :  { %v624_v22 = vmul.f32 %v623_v20, %v605_v21 }
 0x2eb   :  { %v625_v25 = vadd.f32 %v1283_v18, %v624_v22 }
 0x2ed   :  { %v1603_v12 = vsel %vm631_vm15, %v625_v25, %v1580_v29 }
 0x2ee   :  { %v633_v27 = vpack.c.bf16 %v1603_v12, %v1603_v12 }
 0x2f0   :  { %1202 = vmatmul.msk.bf16.vlgmr.msrb.gmra.mxu3 %vm174_vm13, %v633_v27  ;;  %1203 = vmatmul.msk.bf16.vlgmr.msra.gmra.mxu0 %vm174_vm13, %v633_v27 }
 0x2f1   :  { %1206 = vmatmul.msk.bf16.vlgmr.msra.gmra.mxu1 %vm174_vm13, %v633_v27  ;;  %943 = vmatpush.bf16.msrb.mxu3 %v1456_v8 }
 0x2f2   :  { %985 = vmatpush.bf16.msra.mxu0 %v1440_v2  ;;  %998 = vmatpush.bf16.msra.mxu1 %v1448_v5 }
 0x2f5   :  { %944 = vmatpush.bf16.msrb.mxu3 %v1467_v11 }
 0x2f6   :  { %986 = vmatpush.bf16.msra.mxu0 %v1451_v6  ;;  %999 = vmatpush.bf16.msra.mxu1 %v1459_v9 }
 0x319   :  { %v741_v15 = vpop.permute.xlu2 %740 }
 0x31a   :  { %vm742_vm8 = vcmp.eq.s32.totalorder %v741_v15, 1 }
 0x36d   :  { %v659_v28 = vpop.f32.mrf.mxu0 }
 0x36e   :  { %v718_v30 = vpop.f32.mrf.mxu1  ;;  %v687_v32 = vrot.slane %v659_v28, 2 }
 0x36f   :  { %v719_v48 = vadd.f32 %v1530_v50, %v718_v30 }
 0x370   :  { %v689_v34 = vadd.f32 %v687_v32, %v1514_v26 }
 0x371   :  { %v723_v33 = vrot.slane %v719_v48, 2 }
 0x372   :  { %v1205_v2 = vmul.f32 -1.442695, %v689_v34 }
 0x373   :  { %v646_v35 = vpop.f32.mrf.mxu3 }
 0x374   :  { %v664_v38 = vrot.slane %v646_v35, 2 }
 0x375   :  { %v661_v29 = vpop.f32.mrf.mxu0 }
 0x376   :  { %v666_v39 = vadd.f32 %v664_v38, %v1512_v24  ;;  %v720_v36 = vpop.f32.mrf.mxu1 }
 0x378   :  { %v1204_v40 = vmul.f32 -1.442695, %v666_v39 }
 0x37a   :  { %1284 = vpow2.f32 %v1204_v40 }
 0x37b   :  { %1286 = vpow2.f32 %v1205_v2  ;;  %v648_v5 = vpop.f32.mrf.mxu3 }
 0x380   :  { %v1285_v41 = vpop.eup %1284 }
 0x381   :  { %v1287_v6 = vpop.eup %1286  ;;  %v670_v42 = vadd.f32 1.0, %v1285_v41 }
 0x382   :  { %v693_v9 = vadd.f32 1.0, %v1287_v6 }
 0x383   :  { %1288 = vrcp.f32 %v670_v42  ;;  %v682_v46 = vand.u32 2147483648, %v670_v42  ;;  %v680_v51 = vand.u32 2147483647, %v670_v42  ;;  %vm676_vm1 = vweird.f32 %v670_v42 }
 0x384   :  { %1290 = vrcp.f32 %v693_v9  ;;  %v705_v62 = vand.u32 2147483648, %v693_v9  ;;  %vm699_vm5 = vweird.f32 %v693_v9  ;;  %v703_v63 = vand.u32 2147483647, %v693_v9 }
 0x385   :  { %v683_v54 = vor.u32 1.1754944e-38, %v682_v46  ;;  %vm681_vm3 = vcmp.eq.f32.partialorder %v680_v51, 8.507059e+37 }
 0x386   :  { %v706_v7 = vor.u32 1.1754944e-38, %v705_v62  ;;  %vm704_vm7 = vcmp.eq.f32.partialorder %v703_v63, 8.507059e+37 }
 0x389   :  { %v1289_v43 = vpop.eup %1288 }
 0x38a   :  { %v672_v44 = vmul.f32 %v1289_v43, %v670_v42  ;;  %v1291_v47 = vpop.eup %1290  ;;  %vm677_vm0 = vweird.f32 %v1289_v43 }
 0x38b   :  { %v695_v53 = vmul.f32 %v1291_v47, %v693_v9  ;;  %vm678_vm2 = vmor %vm676_vm1, %vm677_vm0  ;;  %vm700_vm4 = vweird.f32 %v1291_v47 }
 0x38c   :  { %v673_v45 = vsub.f32 1.0, %v672_v44  ;;  %vm701_vm6 = vmor %vm699_vm5, %vm700_vm4 }
 0x38d   :  { %v696_v57 = vsub.f32 1.0, %v695_v53 }
 0x38e   :  { %v674_v49 = vmul.f32 %v1289_v43, %v673_v45 }
 0x38f   :  { %v697_v59 = vmul.f32 %v1291_v47, %v696_v57 }
 0x390   :  { %v675_v52 = vadd.f32 %v1289_v43, %v674_v49 }
 0x391   :  { %v698_v60 = vadd.f32 %v1291_v47, %v697_v59 }
 0x392   :  { %v679_v55 = vsel %vm678_vm2, %v1289_v43, %v675_v52 }
 0x393   :  { %v684_v37 = vsel %vm681_vm3, %v683_v54, %v679_v55  ;;  %v702_v3 = vsel %vm701_vm6, %v1291_v47, %v698_v60 }
 0x394   :  { %v725_v56 = vmul.f32 %v723_v33, %v684_v37  ;;  %v707_v14 = vsel %vm704_vm7, %v706_v7, %v702_v3 }
 0x396   :  { %v726_v58 = vadd.f32 %v725_v56, %v1519_v31 }
 0x398   :  { %1292 = vtanh.f32 %v726_v58 }
 0x39e   :  { %v1293_v61 = vpop.eup %1292 }
 0x39f   :  { %v729_v1 = vrot.slane %v1293_v61, 6 }
 0x3a1   :  { %v731_v4 = vsub.f32 %v1603_v12, %v729_v1 }
 0x3a3   :  { %v733_v13 = vrot.slane %v731_v4, 2 }
 0x3a5   :  { %v735_v10 = vmul.f32 %v733_v13, %v707_v14 }
 0x3a7   :  { %v736_v16 = vadd.f32 %v1293_v61, %v735_v10  ;;  %v855_v61 = vpop.permute.xlu2 %854 }
 0x3a8   :  { %vm856_vm2 = vcmp.eq.s32.totalorder %v855_v61, 1 }
 0x3a9   :  { %v744_v17 = vrot.slane %v736_v16, 6 }
 0x3ab   :  { %v1622_v0 = vsel %vm742_vm8, %v744_v17, %v1603_v12 }
 0x3ac   :  { %v747_v18 = vpack.c.bf16 %v1622_v0, %v1622_v0 }
 0x3ae   :  { %1207 = vmatmul.msk.bf16.vlgmr.msra.gmra.mxu2 %vm174_vm13, %v747_v18  ;;  %1208 = vmatmul.msk.bf16.vlgmr.msra.gmra.mxu3 %vm174_vm13, %v747_v18 }
 0x3af   :  { %1211 = vmatmul.msk.bf16.vlgmr.msrb.gmra.mxu0 %vm174_vm13, %v747_v18  ;;  %1051 = vmatpush.bf16.msra.mxu2 %v1456_v8 }
 0x3b3   :  { %1052 = vmatpush.bf16.msra.mxu2 %v1467_v11 }
 0x42c   :  { %v832_v19 = vpop.f32.mrf.mxu0 }
 0x42d   :  { %v833_v5 = vadd.f32 %v1530_v50, %v832_v19 }
 0x42f   :  { %v837_v44 = vrot.slane %v833_v5, 4 }
 0x431   :  { %v760_v20 = vpop.f32.mrf.mxu2  ;;  %v773_v21 = vpop.f32.mrf.mxu3 }
 0x432   :  { %v778_v22 = vrot.slane %v760_v20, 4  ;;  %v801_v23 = vrot.slane %v773_v21, 4 }
 0x434   :  { %v780_v25 = vadd.f32 %v778_v22, %v1512_v24  ;;  %v803_v12 = vadd.f32 %v801_v23, %v1514_v26  ;;  %v834_v27 = vpop.f32.mrf.mxu0 }
 0x436   :  { %v1209_v28 = vmul.f32 -1.442695, %v780_v25  ;;  %v1210_v30 = vmul.f32 -1.442695, %v803_v12 }
 0x438   :  { %1294 = vpow2.f32 %v1209_v28 }
 0x439   :  { %1296 = vpow2.f32 %v1210_v30  ;;  %v762_v32 = vpop.f32.mrf.mxu2  ;;  %v775_v34 = vpop.f32.mrf.mxu3 }
 0x43e   :  { %v1295_v35 = vpop.eup %1294 }
 0x43f   :  { %v1297_v8 = vpop.eup %1296  ;;  %v784_v38 = vadd.f32 1.0, %v1295_v35 }
 0x440   :  { %v807_v11 = vadd.f32 1.0, %v1297_v8 }
 0x441   :  { %1298 = vrcp.f32 %v784_v38  ;;  %v796_v2 = vand.u32 2147483648, %v784_v38  ;;  %v794_v6 = vand.u32 2147483647, %v784_v38  ;;  %vm790_vm10 = vweird.f32 %v784_v38 }
 0x442   :  { %1300 = vrcp.f32 %v807_v11  ;;  %v819_v54 = vand.u32 2147483648, %v807_v11  ;;  %vm813_vm15 = vweird.f32 %v807_v11  ;;  %v817_v33 = vand.u32 2147483647, %v807_v11 }
 0x443   :  { %v797_v9 = vor.u32 1.1754944e-38, %v796_v2  ;;  %vm795_vm12 = vcmp.eq.f32.partialorder %v794_v6, 8.507059e+37 }
 0x444   :  { %v820_v57 = vor.u32 1.1754944e-38, %v819_v54  ;;  %vm818_vm1 = vcmp.eq.f32.partialorder %v817_v33, 8.507059e+37 }
 0x447   :  { %v1299_v29 = vpop.eup %1298 }
 0x448   :  { %v786_v39 = vmul.f32 %v1299_v29, %v784_v38  ;;  %v1301_v40 = vpop.eup %1300  ;;  %vm791_vm9 = vweird.f32 %v1299_v29 }
 0x449   :  { %vm792_vm11 = vmor %vm790_vm10, %vm791_vm9  ;;  %v809_v43 = vmul.f32 %v1301_v40, %v807_v11  ;;  %vm814_vm14 = vweird.f32 %v1301_v40 }
 0x44a   :  { %v787_v36 = vsub.f32 1.0, %v786_v39  ;;  %vm815_vm0 = vmor %vm813_vm15, %vm814_vm14 }
 0x44b   :  { %v810_v48 = vsub.f32 1.0, %v809_v43 }
 0x44c   :  { %v788_v41 = vmul.f32 %v1299_v29, %v787_v36 }
 0x44d   :  { %v811_v51 = vmul.f32 %v1301_v40, %v810_v48 }
 0x44e   :  { %v789_v42 = vadd.f32 %v1299_v29, %v788_v41 }
 0x44f   :  { %v812_v52 = vadd.f32 %v1301_v40, %v811_v51 }
 0x450   :  { %v793_v45 = vsel %vm792_vm11, %v1299_v29, %v789_v42 }
 0x451   :  { %v798_v46 = vsel %vm795_vm12, %v797_v9, %v793_v45  ;;  %v816_v37 = vsel %vm815_vm0, %v1301_v40, %v812_v52  ;;  %v969_v52 = vpop.permute.xlu0 %968 }
 0x452   :  { %v839_v47 = vmul.f32 %v837_v44, %v798_v46  ;;  %v821_v59 = vsel %vm818_vm1, %v820_v57, %v816_v37  ;;  %vm970_vm11 = vcmp.eq.s32.totalorder %v969_v52, 1 }
 0x454   :  { %v840_v49 = vadd.f32 %v839_v47, %v1519_v31 }
 0x456   :  { %1302 = vtanh.f32 %v840_v49 }
 0x45c   :  { %v1303_v53 = vpop.eup %1302 }
 0x45d   :  { %v843_v55 = vrot.slane %v1303_v53, 4 }
 0x45f   :  { %v845_v56 = vsub.f32 %v1622_v0, %v843_v55 }
 0x461   :  { %v847_v58 = vrot.slane %v845_v56, 4 }
 0x463   :  { %v849_v60 = vmul.f32 %v847_v58, %v821_v59 }
 0x465   :  { %v850_v62 = vadd.f32 %v1303_v53, %v849_v60 }
 0x467   :  { %v858_v63 = vrot.slane %v850_v62, 4 }
 0x469   :  { %v1637_v1 = vsel %vm856_vm2, %v858_v63, %v1622_v0 }
 0x46a   :  { %v861_v3 = vpack.c.bf16 %v1637_v1, %v1637_v1 }
 0x46c   :  { %1212 = vmatmul.msk.bf16.vlgmr.msrb.gmra.mxu1 %vm174_vm13, %v861_v3  ;;  %1213 = vmatmul.msk.bf16.vlgmr.msrb.gmra.mxu2 %vm174_vm13, %v861_v3 }
 0x46d   :  { %1216 = vmatmul.msk.bf16.vlgmr.msrb.gmra.mxu3 %vm174_vm13, %v861_v3  ;;  %v1073_v3 = vld [vmem:[%s1693_s6 + $0x10] sm:$0xff] }
 0x4e9   :  { %v874_v4 = vpop.f32.mrf.mxu1 }
 0x4ea   :  { %v892_v7 = vrot.slane %v874_v4, 6 }
 0x4ec   :  { %v894_v13 = vadd.f32 %v892_v7, %v1512_v24 }
 0x4ee   :  { %v1214_v14 = vmul.f32 -1.442695, %v894_v13 }
 0x4ef   :  { %v887_v10 = vpop.f32.mrf.mxu2 }
 0x4f0   :  { %1304 = vpow2.f32 %v1214_v14  ;;  %v915_v15 = vrot.slane %v887_v10, 6  ;;  %v946_v16 = vpop.f32.mrf.mxu3  ;;  %v1071_v14 = vld [vmem:[%s1693_s6] sm:$0xff] }
 0x4f1   :  { %v876_v17 = vpop.f32.mrf.mxu1  ;;  %v947_v35 = vadd.f32 %v1530_v50, %v946_v16 }
 0x4f2   :  { %v917_v0 = vadd.f32 %v915_v15, %v1514_v26 }
 0x4f3   :  { %v951_v36 = vrot.slane %v947_v35, 6 }
 0x4f4   :  { %v1215_v18 = vmul.f32 -1.442695, %v917_v0 }
 0x4f6   :  { %v1305_v19 = vpop.eup %1304  ;;  %1306 = vpow2.f32 %v1215_v18 }
 0x4f7   :  { %v898_v20 = vadd.f32 1.0, %v1305_v19  ;;  %v889_v21 = vpop.f32.mrf.mxu2 }
 0x4f8   :  { %v948_v22 = vpop.f32.mrf.mxu3 }
 0x4f9   :  { %1308 = vrcp.f32 %v898_v20  ;;  %v910_v30 = vand.u32 2147483648, %v898_v20  ;;  %v908_v34 = vand.u32 2147483647, %v898_v20  ;;  %vm904_vm4 = vweird.f32 %v898_v20 }
 0x4fb   :  { %v911_v29 = vor.u32 1.1754944e-38, %v910_v30  ;;  %vm909_vm6 = vcmp.eq.f32.partialorder %v908_v34, 8.507059e+37 }
 0x4fc   :  { %v1307_v23 = vpop.eup %1306 }
 0x4fd   :  { %v921_v25 = vadd.f32 1.0, %v1307_v23 }
 0x4ff   :  { %v1309_v12 = vpop.eup %1308  ;;  %1310 = vrcp.f32 %v921_v25  ;;  %v933_v50 = vand.u32 2147483648, %v921_v25  ;;  %vm927_vm8 = vweird.f32 %v921_v25  ;;  %v931_v43 = vand.u32 2147483647, %v921_v25 }
 0x500   :  { %v900_v27 = vmul.f32 %v1309_v12, %v898_v20  ;;  %vm905_vm3 = vweird.f32 %v1309_v12 }
 0x501   :  { %vm906_vm5 = vmor %vm904_vm4, %vm905_vm3  ;;  %v934_v47 = vor.u32 1.1754944e-38, %v933_v50  ;;  %vm932_vm10 = vcmp.eq.f32.partialorder %v931_v43, 8.507059e+37 }
 0x502   :  { %v901_v28 = vsub.f32 1.0, %v900_v27  ;;  %v1328_v27 = vld [vmem:[%s1692_s5 + $0x2] ss:$0 sm:$0xff] }
 0x504   :  { %v902_v32 = vmul.f32 %v1309_v12, %v901_v28 }
 0x505   :  { %v1311_v8 = vpop.eup %1310 }
 0x506   :  { %v903_v38 = vadd.f32 %v1309_v12, %v902_v32  ;;  %v923_v11 = vmul.f32 %v1311_v8, %v921_v25  ;;  %vm928_vm7 = vweird.f32 %v1311_v8 }
 0x507   :  { %vm929_vm9 = vmor %vm927_vm8, %vm928_vm7 }
 0x508   :  { %v907_v39 = vsel %vm906_vm5, %v1309_v12, %v903_v38  ;;  %v924_v5 = vsub.f32 1.0, %v923_v11 }
 0x509   :  { %v912_v2 = vsel %vm909_vm6, %v911_v29, %v907_v39  ;;  %vm1102_vm6 = vcmask 25600  }
 0x50a   :  { %v953_v40 = vmul.f32 %v951_v36, %v912_v2  ;;  %v925_v6 = vmul.f32 %v1311_v8, %v924_v5  ;;  %v1068_v5 = vpop.permute.xlu1 %1067 }
 0x50b   :  { %vm1069_vm5 = vcmp.eq.s32.totalorder %v1068_v5, 1 }
 0x50c   :  { %v954_v41 = vadd.f32 %v953_v40, %v1519_v31  ;;  %v926_v42 = vadd.f32 %v1311_v8, %v925_v6 }
 0x50e   :  { %1312 = vtanh.f32 %v954_v41  ;;  %v930_v45 = vsel %vm929_vm9, %v1311_v8, %v926_v42  ;;  %v1243_v42 = vld [vmem:[%s1694_s7] ss:$0 sm:$0xff]  ;;  %s1122_s7 = sshll.u32 %s1385_s16, 4  ;;  %s1123_s7 = int_to_ptr.vmem [resolvable:$true] %s1122_s7 }
 0x50f   :  { %v935_v49 = vsel %vm932_vm10, %v934_v47, %v930_v45 }
 0x514   :  { %v1313_v9 = vpop.eup %1312 }
 0x515   :  { %v957_v44 = vrot.slane %v1313_v9, 2 }
 0x517   :  { %v959_v46 = vsub.f32 %v1637_v1, %v957_v44 }
 0x519   :  { %v961_v48 = vrot.slane %v959_v46, 6 }
 0x51b   :  { %v963_v51 = vmul.f32 %v961_v48, %v935_v49 }
 0x51d   :  { %v964_v53 = vadd.f32 %v1313_v9, %v963_v51 }
 0x51f   :  { %v972_v54 = vrot.slane %v964_v53, 2 }
 0x521   :  { %v1650_v33 = vsel %vm970_vm11, %v972_v54, %v1637_v1  ;;  %v1074_v1 = vld [vmem:[%s1693_s6 + $0x18] sm:$0xff] }
 0x522   :  { %v975_v55 = vpack.c.bf16 %v1650_v33, %v1650_v33  ;;  %1094 = vmatpush.msra.mxu3 %v1074_v1 }
 0x524   :  { %1217 = vmatmul.msk.bf16.vlgmr.msra.gmra.mxu0 %vm174_vm13, %v975_v55  ;;  %1218 = vmatmul.msk.bf16.vlgmr.msra.gmra.mxu1 %vm174_vm13, %v975_v55 }
 0x525   :  { %1221 = vmatmul.msk.bf16.vlgmr.msra.gmra.mxu2 %vm174_vm13, %v975_v55  ;;  %1095 = vmatpush.msra.mxu3 %v1073_v3 }
 0x5a1   :  { %v988_v37 = vpop.f32.mrf.mxu0  ;;  %v1001_v56 = vpop.f32.mrf.mxu1 }
 0x5a2   :  { %v1005_v57 = vadd.f32 %v988_v37, %v1512_v24  ;;  %v1025_v58 = vadd.f32 %v1001_v56, %v1514_v26  ;;  %v1072_v26 = vld [vmem:[%s1693_s6 + $0x8] sm:$0xff] }
 0x5a3   :  { %1096 = vmatpush.msra.mxu3 %v1072_v26 }
 0x5a4   :  { %v1219_v59 = vmul.f32 -1.442695, %v1005_v57  ;;  %v1220_v60 = vmul.f32 -1.442695, %v1025_v58 }
 0x5a5   :  { %1097 = vmatpush.msra.mxu3 %v1071_v14 }
 0x5a6   :  { %1314 = vpow2.f32 %v1219_v59 }
 0x5a7   :  { %1316 = vpow2.f32 %v1220_v60 }
 0x5a8   :  { %v1054_v61 = vpop.f32.mrf.mxu2 }
 0x5a9   :  { %v990_v62 = vpop.f32.mrf.mxu0  ;;  %v1003_v63 = vpop.f32.mrf.mxu1  ;;  %v1055_v28 = vadd.f32 %v1328_v27, %v1054_v61 }
 0x5ac   :  { %v1315_v4 = vpop.eup %1314 }
 0x5ad   :  { %v1317_v24 = vpop.eup %1316  ;;  %v1009_v7 = vadd.f32 1.0, %v1315_v4 }
 0x5ae   :  { %v1029_v13 = vadd.f32 1.0, %v1317_v24 }
 0x5af   :  { %1318 = vrcp.f32 %v1009_v7  ;;  %v1021_v19 = vand.u32 2147483648, %v1009_v7  ;;  %v1019_v21 = vand.u32 2147483647, %v1009_v7  ;;  %vm1015_vm14 = vweird.f32 %v1009_v7 }
 0x5b0   :  { %1320 = vrcp.f32 %v1029_v13  ;;  %v1056_v10 = vpop.f32.mrf.mxu2  ;;  %v1041_v38 = vand.u32 2147483648, %v1029_v13  ;;  %vm1035_vm2 = vweird.f32 %v1029_v13  ;;  %v1039_v11 = vand.u32 2147483647, %v1029_v13 }
 0x5b1   :  { %v1022_v25 = vor.u32 1.1754944e-38, %v1021_v19  ;;  %vm1020_vm0 = vcmp.eq.f32.partialorder %v1019_v21, 8.507059e+37 }
 0x5b2   :  { %v1042_v36 = vor.u32 1.1754944e-38, %v1041_v38  ;;  %vm1040_vm4 = vcmp.eq.f32.partialorder %v1039_v11, 8.507059e+37 }
 0x5b5   :  { %v1319_v15 = vpop.eup %1318 }
 0x5b6   :  { %v1321_v16 = vpop.eup %1320  ;;  %v1011_v17 = vmul.f32 %v1319_v15, %v1009_v7  ;;  %vm1016_vm12 = vweird.f32 %v1319_v15 }
 0x5b7   :  { %v1031_v18 = vmul.f32 %v1321_v16, %v1029_v13  ;;  %vm1017_vm15 = vmor %vm1015_vm14, %vm1016_vm12  ;;  %vm1036_vm1 = vweird.f32 %v1321_v16 }
 0x5b8   :  { %v1012_v0 = vsub.f32 1.0, %v1011_v17  ;;  %vm1037_vm3 = vmor %vm1035_vm2, %vm1036_vm1 }
 0x5b9   :  { %v1032_v23 = vsub.f32 1.0, %v1031_v18 }
 0x5ba   :  { %v1013_v20 = vmul.f32 %v1319_v15, %v1012_v0 }
 0x5bb   :  { %v1033_v34 = vmul.f32 %v1321_v16, %v1032_v23 }
 0x5bc   :  { %v1014_v22 = vadd.f32 %v1319_v15, %v1013_v20 }
 0x5bd   :  { %v1034_v8 = vadd.f32 %v1321_v16, %v1033_v34 }
 0x5be   :  { %v1018_v12 = vsel %vm1017_vm15, %v1319_v15, %v1014_v22 }
 0x5bf   :  { %v1023_v30 = vsel %vm1020_vm0, %v1022_v25, %v1018_v12  ;;  %v1038_v29 = vsel %vm1037_vm3, %v1321_v16, %v1034_v8 }
 0x5c0   :  { %v1058_v32 = vmul.f32 %v1055_v28, %v1023_v30  ;;  %v1043_v40 = vsel %vm1040_vm4, %v1042_v36, %v1038_v29 }
 0x5c2   :  { %v1059_v35 = vadd.f32 %v1058_v32, %v1519_v31 }
 0x5c4   :  { %1322 = vtanh.f32 %v1059_v35 }
 0x5ca   :  { %v1323_v39 = vpop.eup %1322 }
 0x5cb   :  { %v1061_v2 = vsub.f32 %v1650_v33, %v1323_v39 }
 0x5cd   :  { %v1062_v41 = vmul.f32 %v1061_v2, %v1043_v40 }
 0x5cf   :  { %v1063_v6 = vadd.f32 %v1323_v39, %v1062_v41 }
 0x5d1   :  { %v1070_v31 = vsel %vm1069_vm5, %v1063_v6, %v1650_v33 }
 0x5d2   :  { %1222 = vmatmul.msk.f32.vlgmr.msra.gmra.mxu3 %vm174_vm13, %v1070_v31 }
 0x655   :  { %v1099_v9 = vpop.f32.mrf.mxu3 }
 0x656   :  { %v1100_v50 = vadd.f32 %v1243_v42, %v1099_v9 }
 0x658   :  { %v1103_v43 = vsel %vm1102_vm6, %v1100_v50, -inf }
 0x659   :  { %1104 = vmax.xlane.f32.xlu2 %v1103_v43 }
 0x6cc   :  { %v1105_v44 = vpop.xlane.xlu2 %1104 }
 0x6cd   :  { %v1106_v45 = vsub.f32 %v1100_v50, %v1105_v44 }
 0x6cf   :  { %v1107_v46 = vmul.f32 1.442695, %v1106_v45 }
 0x6d1   :  { %1324 = vpow2.f32 %v1107_v46 }
 0x6d7   :  { %v1325_v47 = vpop.eup %1324 }
 0x6d8   :  { %v1109_v48 = vsel %vm1102_vm6, %v1325_v47, 0.0 }
 0x6d9   :  { %1110 = vadd.xlane.f32.xlu0 %v1109_v48 }
 0x74c   :  { %v1111_v49 = vpop.xlane.xlu0 %1110 }
 0x74d   :  { %1326 = vlog2.f32 %v1111_v49 }
 0x753   :  { %v1327_v51 = vpop.eup %1326 }
 0x754   :  { %v1113_v52 = vmul.f32 0.6931472, %v1327_v51 }
 0x756   :  { %v1114_v53 = vadd.f32 %v1113_v52, %v1105_v44 }
 0x758   :  { %v1115_v54 = vsub.f32 %v1100_v50, %v1114_v53 }
 0x75a   :  { %1116 = vst.msk [vmem:[#allocation5] sm:$0x3] %vm1102_vm6, %v1115_v54 }
 0x75b   :  { %1127 = dma.vmem_to_hbm [thread:$0]  %s1123_s7, 32, %s1125_s0, [#allocation4]  }
 0x75c   :  { %1379 = dma.done.wait [#allocation4], 32  }
 0x75d   :  { %1380 = vsyncadd [#allocation4], 4294967264 }
 0x75e   :  { %1132 = vsyncpa [#allocation3], 1 }
 0x75f   :  { %1133 = vsyncpa [#allocation4], 1 }

</bundles_post_ra>
